<compile_context>
chip_gen: v5e
topology: v5e:2x2
jax: 0.10.0
libtpu: 0.0.40
codegen_flags: <defaults>
</compile_context>

<pallas_src>
import functools

import jax
import jax.numpy as jnp
from jax.experimental import pallas as pl
from jax.experimental.pallas import tpu as pltpu

_EPS = 1e-5
_LANES = 128      # channel padding granularity (lane-dense outputs)
_TM = 512         # M tile (im2col rows / pixels) for the tiled matmul
_TK = 512         # max contraction tile (single block below this)


def _round_up(x, m):
    return (x + m - 1) // m * m


def _pick_tn(cout_pad):
    # cout_pad is a multiple of 128; prefer 256-wide output tiles when they divide.
    return 256 if cout_pad % 256 == 0 else 128


def _pad_vec(v, n):
    return jnp.pad(v.astype(jnp.float32), (0, n - v.shape[0]))


# ----------------------------- Pallas kernels -------------------------------

def _matmul_bn_kernel(x_ref, w_ref, s_ref, b_ref, o_ref, acc_ref, *, apply_relu):
    # One (tm, tn) output tile; K is the innermost ("arbitrary") reduction axis.
    k = pl.program_id(2)

    @pl.when(k == 0)
    def _init():
        acc_ref[...] = jnp.zeros_like(acc_ref)

    acc_ref[...] += jnp.dot(x_ref[...], w_ref[...],
                            preferred_element_type=jnp.float32)

    @pl.when(k == pl.num_programs(2) - 1)
    def _epilogue():
        y = acc_ref[...] * s_ref[...] + b_ref[...]
        if apply_relu:
            y = jnp.maximum(y, 0.0)
        o_ref[...] = y.astype(o_ref.dtype)


def _matmul_bn_res_kernel(x_ref, w_ref, s_ref, b_ref, r_ref, o_ref, acc_ref):
    # Final conv of a bottleneck: conv + BN + residual add + ReLU (residual only on
    # the last K step).
    k = pl.program_id(2)

    @pl.when(k == 0)
    def _init():
        acc_ref[...] = jnp.zeros_like(acc_ref)

    acc_ref[...] += jnp.dot(x_ref[...], w_ref[...],
                            preferred_element_type=jnp.float32)

    @pl.when(k == pl.num_programs(2) - 1)
    def _epilogue():
        y = acc_ref[...] * s_ref[...] + b_ref[...] + r_ref[...].astype(jnp.float32)
        o_ref[...] = jnp.maximum(y, 0.0).astype(o_ref.dtype)


def _conv3x3_kernel(x0_ref, x1_ref, x2_ref, w_ref, s_ref, b_ref, o_ref, *, w_out):
    # Direct 3x3 / stride-1 / pad-1 conv for one output row: the three input rows of
    # the window arrive as three BlockSpec views of the padded activation; the three
    # column taps are static slices; 9 (Cin x Cout) matmuls accumulate in f32.
    tn = o_ref.shape[-1]
    acc = jnp.zeros((w_out, tn), jnp.float32)
    for dh, x_ref in enumerate((x0_ref, x1_ref, x2_ref)):
        row = x_ref[...]                                   # (W + 2, Cin_pad) bf16
        for dw in range(3):
            acc = acc + jnp.dot(row[dw:dw + w_out, :], w_ref[dh, dw],
                                preferred_element_type=jnp.float32)
    y = acc * s_ref[...] + b_ref[...]
    o_ref[...] = jnp.maximum(y, 0.0).astype(o_ref.dtype)


def _max9_kernel(*refs):
    # refs = 9 input taps + 1 output, all (tm, C).
    o_ref = refs[-1]
    m = refs[0][...]
    for r in refs[1:-1]:
        m = jnp.maximum(m, r[...])
    o_ref[...] = m


# --------------------------- fused matmul wrapper ----------------------------

def _fused_matmul(patches, w2, scale_pad, bias_pad, residual=None, relu=True,
                  out_dtype=jnp.bfloat16):
    """(M, K) x (K, Cout_pad) matmul + folded BN (+ residual) (+ ReLU), tiled."""
    M, K = patches.shape
    cout = w2.shape[1]
    assert cout % _LANES == 0

    tm = min(_TM, _round_up(M, 8))
    tn = _pick_tn(cout)
    tk = _round_up(K, 8) if K <= _TK else _TK
    Mp = _round_up(M, tm)
    Kp = _round_up(K, tk)

    xp = jnp.pad(patches.astype(jnp.bfloat16), ((0, Mp - M), (0, Kp - K)))
    wp = jnp.pad(w2.astype(jnp.bfloat16), ((0, Kp - K), (0, 0)))
    s2 = scale_pad.reshape(1, cout).astype(jnp.float32)
    b2 = bias_pad.reshape(1, cout).astype(jnp.float32)

    grid = (Mp // tm, cout // tn, Kp // tk)
    x_spec = pl.BlockSpec((tm, tk), lambda i, j, k: (i, k))
    w_spec = pl.BlockSpec((tk, tn), lambda i, j, k: (k, j))
    v_spec = pl.BlockSpec((1, tn), lambda i, j, k: (0, j))     # scale / bias
    o_spec = pl.BlockSpec((tm, tn), lambda i, j, k: (i, j))

    if residual is None:
        kern = functools.partial(_matmul_bn_kernel, apply_relu=relu)
        ins = [xp, wp, s2, b2]
        in_specs = [x_spec, w_spec, v_spec, v_spec]
    else:
        rp = jnp.pad(residual.astype(jnp.bfloat16), ((0, Mp - M), (0, 0)))
        kern = _matmul_bn_res_kernel
        ins = [xp, wp, s2, b2, rp]
        in_specs = [x_spec, w_spec, v_spec, v_spec, o_spec]

    out = pl.pallas_call(
        kern,
        out_shape=jax.ShapeDtypeStruct((Mp, cout), out_dtype),
        grid=grid,
        in_specs=in_specs,
        out_specs=o_spec,
        scratch_shapes=[pltpu.VMEM((tm, tn), jnp.float32)],
        compiler_params=pltpu.CompilerParams(
            dimension_semantics=("parallel", "parallel", "arbitrary")),
    )(*ins)
    return out[:M]


# ------------------------------ conv wrappers --------------------------------

def _im2col(x, k, stride, pad):
    # x: NHWC -> (N*Ho*Wo, k*k*C), patch element order (kh, kw, Cin).
    if pad:
        x = jnp.pad(x, ((0, 0), (pad, pad), (pad, pad), (0, 0)))
    n, h, w, c = x.shape
    ho = (h - k) // stride + 1
    wo = (w - k) // stride + 1
    cols = []
    for dh in range(k):
        for dw in range(k):
            cols.append(x[:, dh:dh + stride * (ho - 1) + 1:stride,
                            dw:dw + stride * (wo - 1) + 1:stride, :])
    p = jnp.stack(cols, axis=3)  # (N, Ho, Wo, k*k, C)
    return p.reshape(n * ho * wo, k * k * c), (n, ho, wo)


def conv_stem(x, w_oihw, scale, bias):
    # 7x7 / stride 2 / pad 3 conv + BN + ReLU (im2col path, Cin=3).
    cout, cin, k, _ = w_oihw.shape
    coutp = _round_up(cout, _LANES)
    patches, (n, ho, wo) = _im2col(x, k, stride=2, pad=3)
    w2 = jnp.transpose(w_oihw, (2, 3, 1, 0)).reshape(k * k * cin, cout)
    w2 = jnp.pad(w2, ((0, 0), (0, coutp - cout)))
    sp = _pad_vec(scale, coutp)
    bp = _pad_vec(bias, coutp)
    out = _fused_matmul(patches, w2, sp, bp, relu=True)
    return out.reshape(n, ho, wo, coutp)


def conv1x1_bn(x, w_oihw, scale, bias, relu=True, residual=None):
    # 1x1 conv == channel matmul; x: (N, H, W, Cin_pad) channel-padded bf16.
    n, h, w, cp = x.shape
    cout, cin = w_oihw.shape[0], w_oihw.shape[1]
    coutp = _round_up(cout, _LANES)
    w2 = w_oihw.reshape(cout, cin).T                         # (Cin, Cout)
    w2 = jnp.pad(w2, ((0, cp - cin), (0, coutp - cout)))
    sp = _pad_vec(scale, coutp)
    bp = _pad_vec(bias, coutp)
    patches = x.reshape(n * h * w, cp)
    res = None
    if residual is not None:
        res = residual.reshape(n * h * w, coutp)
    out = _fused_matmul(patches, w2, sp, bp, residual=res, relu=relu)
    return out.reshape(n, h, w, coutp)


def conv3x3_bn_relu(x, w_oihw, scale, bias):
    # Direct (no im2col) 3x3 / stride 1 / pad 1 conv + BN + ReLU.
    n, hh, ww, cp = x.shape
    cout, cin = w_oihw.shape[0], w_oihw.shape[1]
    coutp = _round_up(cout, _LANES)
    tn = _pick_tn(coutp)

    wt = jnp.transpose(w_oihw, (2, 3, 1, 0))                 # (3, 3, Cin, Cout)
    wt = jnp.pad(wt, ((0, 0), (0, 0), (0, cp - cin), (0, coutp - cout)))
    wt = wt.astype(jnp.bfloat16)
    sp = _pad_vec(scale, coutp).reshape(1, coutp)
    bp = _pad_vec(bias, coutp).reshape(1, coutp)

    xpad = jnp.pad(x.astype(jnp.bfloat16), ((0, 0), (1, 1), (1, 1), (0, 0)))
    wpad_cols = ww + 2

    def _row_spec(dh):
        return pl.BlockSpec((None, None, wpad_cols, cp),
                            lambda ni, j, hi: (ni, hi + dh, 0, 0))

    out = pl.pallas_call(
        functools.partial(_conv3x3_kernel, w_out=ww),
        out_shape=jax.ShapeDtypeStruct((n, hh, ww, coutp), jnp.bfloat16),
        grid=(n, coutp // tn, hh),
        in_specs=[_row_spec(0), _row_spec(1), _row_spec(2),
                  pl.BlockSpec((3, 3, cp, tn), lambda ni, j, hi: (0, 0, 0, j)),
                  pl.BlockSpec((1, tn), lambda ni, j, hi: (0, j)),
                  pl.BlockSpec((1, tn), lambda ni, j, hi: (0, j))],
        out_specs=pl.BlockSpec((None, None, ww, tn),
                               lambda ni, j, hi: (ni, hi, 0, j)),
        compiler_params=pltpu.CompilerParams(
            dimension_semantics=("parallel", "parallel", "parallel")),
    )(xpad, xpad, xpad, wt, sp, bp)
    return out


def maxpool_3x3_s2_p1(x):
    # x: (N, H, W, C_pad) bf16; 3x3 window, stride 2, pad 1 (-inf padding).
    n, h, w, c = x.shape
    ho = (h + 2 - 3) // 2 + 1
    wo = (w + 2 - 3) // 2 + 1
    xb = x.astype(jnp.bfloat16)
    xp = jnp.pad(xb, ((0, 0), (1, 1), (1, 1), (0, 0)), constant_values=-jnp.inf)

    m = n * ho * wo
    tm = min(_TM, _round_up(m, 8))
    mp = _round_up(m, tm)

    taps = []
    for dh in range(3):
        for dw in range(3):
            t = xp[:, dh:dh + 2 * (ho - 1) + 1:2, dw:dw + 2 * (wo - 1) + 1:2, :]
            t = t.reshape(m, c)
            taps.append(jnp.pad(t, ((0, mp - m), (0, 0)), constant_values=-jnp.inf))

    spec = pl.BlockSpec((tm, c), lambda i: (i, 0))
    out = pl.pallas_call(
        _max9_kernel,
        out_shape=jax.ShapeDtypeStruct((mp, c), jnp.bfloat16),
        grid=(mp // tm,),
        in_specs=[spec] * 9,
        out_specs=spec,
        compiler_params=pltpu.CompilerParams(dimension_semantics=("parallel",)),
    )(*taps)
    return out[:m].reshape(n, ho, wo, c)


# --------------------------- parameters (synthetic) --------------------------

class _KeyGen:
    def __init__(self, seed):
        self.key = jax.random.PRNGKey(seed)

    def __call__(self):
        self.key, k = jax.random.split(self.key)
        return k


def _init_conv(kg, cout, cin, k):
    fan_in = cin * k * k
    std = (2.0 / fan_in) ** 0.5
    return jax.random.normal(kg(), (cout, cin, k, k), jnp.float32) * std


def _init_bn(kg, c):
    gamma = 1.0 + 0.1 * jax.random.normal(kg(), (c,), jnp.float32)
    beta = 0.1 * jax.random.normal(kg(), (c,), jnp.float32)
    mean = 0.1 * jax.random.normal(kg(), (c,), jnp.float32)
    var = 1.0 + 0.2 * jax.random.uniform(kg(), (c,), jnp.float32)
    scale = gamma / jnp.sqrt(var + _EPS)     # fold BN: y = conv(x) * scale + bias
    bias = beta - mean * scale
    return scale, bias


def init_params(seed=0):
    kg = _KeyGen(seed)
    params = {
        "conv1_w": _init_conv(kg, 64, 3, 7),   # (64, 3, 7, 7) stride 2, pad 3
        "bn1": _init_bn(kg, 64),
        "layer1": [],
    }
    inplanes, planes, expansion = 64, 64, 4
    for b in range(3):  # 3 bottleneck blocks in layer1
        blk = {
            "w1": _init_conv(kg, planes, inplanes, 1), "bn1b": _init_bn(kg, planes),
            "w2": _init_conv(kg, planes, planes, 3),   "bn2b": _init_bn(kg, planes),
            "w3": _init_conv(kg, planes * expansion, planes, 1),
            "bn3b": _init_bn(kg, planes * expansion),
        }
        if b == 0:  # downsample branch (1x1 conv + BN) on the first block
            blk["wd"] = _init_conv(kg, planes * expansion, inplanes, 1)
            blk["bnd"] = _init_bn(kg, planes * expansion)
        params["layer1"].append(blk)
        inplanes = planes * expansion
    return params


# ------------------------------- forward ------------------------------------

def bottleneck(x, blk):
    identity = x
    out = conv1x1_bn(x, blk["w1"], *blk["bn1b"], relu=True)
    out = conv3x3_bn_relu(out, blk["w2"], *blk["bn2b"])
    if "wd" in blk:
        identity = conv1x1_bn(x, blk["wd"], *blk["bnd"], relu=False)
    # conv3 + BN + residual add + ReLU fused inside the tiled Pallas matmul.
    out = conv1x1_bn(out, blk["w3"], *blk["bn3b"], relu=False, residual=identity)
    return out


def resnet50_part1(x_nchw, params):
    x = jnp.transpose(x_nchw, (0, 2, 3, 1))                      # NCHW -> NHWC
    x = conv_stem(x, params["conv1_w"], *params["bn1"])          # channels padded to 128
    x = maxpool_3x3_s2_p1(x)
    for blk in params["layer1"]:
        x = bottleneck(x, blk)
    c_out = params["layer1"][-1]["w3"].shape[0]                  # 256
    x = x[..., :c_out]                                           # drop channel padding
    return jnp.transpose(x, (0, 3, 1, 2)).astype(jnp.float32)    # NHWC -> NCHW


if __name__ == "__main__":
    key = jax.random.PRNGKey(0)
    x = jax.random.normal(key, (2, 3, 16, 16), jnp.float32)      # NCHW like PyTorch
    params = init_params(seed=0)

    fn = jax.jit(lambda inp: resnet50_part1(inp, params))
    out = fn(x)
    out = jax.block_until_ready(out)
    assert out.shape == (2, 256, 4, 4), out.shape
    assert out.dtype == jnp.float32
    print("KERNEL_OK")
</pallas_src>

<mosaic_0001>
module attributes {stable_mosaic.version = 11 : i64} {
  func.func @_matmul_bn_kernel(%arg0: i32, %arg1: i32, %arg2: i32, %arg3: memref<128x152xbf16, #tpu.memory_space<vmem>>, %arg4: memref<152x128xbf16, #tpu.memory_space<vmem>>, %arg5: memref<1x128xf32, #tpu.memory_space<vmem>>, %arg6: memref<1x128xf32, #tpu.memory_space<vmem>>, %arg7: memref<128x128xbf16, #tpu.memory_space<vmem>>, %arg8: memref<128x128xf32, #tpu.memory_space<vmem>>) attributes {dimension_semantics = [#tpu.dimension_semantics<parallel>, #tpu.dimension_semantics<parallel>, #tpu.dimension_semantics<arbitrary>], iteration_bounds = array<i64: 1, 1, 1>, scalar_prefetch = 0 : i64, scratch_operands = 1 : i64, tpu.core_type = #tpu.core_type<tc>, window_params = [{transform_indices = @transform_0, window_bounds = array<i64: 128, 152>}, {transform_indices = @transform_1, window_bounds = array<i64: 152, 128>}, {transform_indices = @transform_2, window_bounds = array<i64: 1, 128>}, {transform_indices = @transform_3, window_bounds = array<i64: 1, 128>}, {transform_indices = @transform_4, window_bounds = array<i64: 128, 128>}]} {
    %c0_i32 = arith.constant 0 : i32
    %0 = arith.cmpi eq, %arg2, %c0_i32 : i32
    %1 = arith.extui %0 : i1 to i32
    %c0_i32_0 = arith.constant 0 : i32
    %2 = arith.cmpi ne, %1, %c0_i32_0 : i32
    scf.if %2 {
      %cst_10 = arith.constant 0.000000e+00 : f32
      %12 = vector.broadcast %cst_10 : f32 to vector<128x128xf32>
      %c0_11 = arith.constant 0 : index
      %c0_12 = arith.constant 0 : index
      %13 = vector.load %arg8[%c0_11, %c0_12] : memref<128x128xf32, #tpu.memory_space<vmem>>, vector<128x128xf32>
      tpu.vector_store %arg8[%c0_11, %c0_12], %12 {strides = array<i32>} : memref<128x128xf32, #tpu.memory_space<vmem>>, vector<128x128xf32>,
    } else {
    }
    %c0 = arith.constant 0 : index
    %c0_1 = arith.constant 0 : index
    %3 = vector.load %arg8[%c0, %c0_1] : memref<128x128xf32, #tpu.memory_space<vmem>>, vector<128x128xf32>
    %c0_2 = arith.constant 0 : index
    %c0_3 = arith.constant 0 : index
    %4 = vector.load %arg3[%c0_2, %c0_3] : memref<128x152xbf16, #tpu.memory_space<vmem>>, vector<128x152xbf16>
    %c0_4 = arith.constant 0 : index
    %c0_5 = arith.constant 0 : index
    %5 = vector.load %arg4[%c0_4, %c0_5] : memref<152x128xbf16, #tpu.memory_space<vmem>>, vector<152x128xbf16>
    %cst = arith.constant dense<0.000000e+00> : vector<128x128xf32>
    %6 = tpu.matmul %4, %5, %cst {dimension_numbers = #tpu.dot_dimension_numbers<[1], [0], [0], [1], [0, 0, 1, 1], [], []>} : vector<128x152xbf16>, vector<152x128xbf16>, vector<128x128xf32> -> vector<128x128xf32>
    %7 = arith.addf %3, %6 : vector<128x128xf32>
    %c0_6 = arith.constant 0 : index
    %c0_7 = arith.constant 0 : index
    %8 = vector.load %arg8[%c0_6, %c0_7] : memref<128x128xf32, #tpu.memory_space<vmem>>, vector<128x128xf32>
    tpu.vector_store %arg8[%c0_6, %c0_7], %7 {strides = array<i32>} : memref<128x128xf32, #tpu.memory_space<vmem>>, vector<128x128xf32>,
    %c0_i32_8 = arith.constant 0 : i32
    %9 = arith.cmpi eq, %arg2, %c0_i32_8 : i32
    %10 = arith.extui %9 : i1 to i32
    %c0_i32_9 = arith.constant 0 : i32
    %11 = arith.cmpi ne, %10, %c0_i32_9 : i32
    scf.if %11 {
      %c0_10 = arith.constant 0 : index
      %c0_11 = arith.constant 0 : index
      %12 = vector.load %arg8[%c0_10, %c0_11] : memref<128x128xf32, #tpu.memory_space<vmem>>, vector<128x128xf32>
      %c0_12 = arith.constant 0 : index
      %c0_13 = arith.constant 0 : index
      %13 = vector.load %arg5[%c0_12, %c0_13] : memref<1x128xf32, #tpu.memory_space<vmem>>, vector<1x128xf32>
      %14 = vector.broadcast %13 : vector<1x128xf32> to vector<128x128xf32>
      %15 = arith.mulf %12, %14 : vector<128x128xf32>
      %c0_14 = arith.constant 0 : index
      %c0_15 = arith.constant 0 : index
      %16 = vector.load %arg6[%c0_14, %c0_15] : memref<1x128xf32, #tpu.memory_space<vmem>>, vector<1x128xf32>
      %17 = vector.broadcast %16 : vector<1x128xf32> to vector<128x128xf32>
      %18 = arith.addf %15, %17 : vector<128x128xf32>
      %cst_16 = arith.constant 0.000000e+00 : f32
      %19 = vector.broadcast %cst_16 : f32 to vector<128x128xf32>
      %20 = arith.maximumf %18, %19 : vector<128x128xf32>
      %21 = arith.truncf %20 : vector<128x128xf32> to vector<128x128xbf16>
      %c0_17 = arith.constant 0 : index
      %c0_18 = arith.constant 0 : index
      %22 = vector.load %arg7[%c0_17, %c0_18] : memref<128x128xbf16, #tpu.memory_space<vmem>>, vector<128x128xbf16>
      tpu.vector_store %arg7[%c0_17, %c0_18], %21 {strides = array<i32>} : memref<128x128xbf16, #tpu.memory_space<vmem>>, vector<128x128xbf16>,
    } else {
    }
    return
  }
  func.func @transform_0(%arg0: i32, %arg1: i32, %arg2: i32) -> (i32, i32) {
    %c0_i32 = arith.constant 0 : i32
    return %arg0, %arg2 : i32, i32
  }
  func.func @transform_1(%arg0: i32, %arg1: i32, %arg2: i32) -> (i32, i32) {
    %c0_i32 = arith.constant 0 : i32
    return %arg2, %arg1 : i32, i32
  }
  func.func @transform_2(%arg0: i32, %arg1: i32, %arg2: i32) -> (i32, i32) {
    %c0_i32 = arith.constant 0 : i32
    %c0_i32_0 = arith.constant 0 : i32
    return %c0_i32, %arg1 : i32, i32
  }
  func.func @transform_3(%arg0: i32, %arg1: i32, %arg2: i32) -> (i32, i32) {
    %c0_i32 = arith.constant 0 : i32
    %c0_i32_0 = arith.constant 0 : i32
    return %c0_i32, %arg1 : i32, i32
  }
  func.func @transform_4(%arg0: i32, %arg1: i32, %arg2: i32) -> (i32, i32) {
    %c0_i32 = arith.constant 0 : i32
    return %arg0, %arg1 : i32, i32
  }
}

module attributes {stable_mosaic.version = 11 : i64} {
  func.func @_max9_kernel(%arg0: i32, %arg1: memref<32x128xbf16, #tpu.memory_space<vmem>>, %arg2: memref<32x128xbf16, #tpu.memory_space<vmem>>, %arg3: memref<32x128xbf16, #tpu.memory_space<vmem>>, %arg4: memref<32x128xbf16, #tpu.memory_space<vmem>>, %arg5: memref<32x128xbf16, #tpu.memory_space<vmem>>, %arg6: memref<32x128xbf16, #tpu.memory_space<vmem>>, %arg7: memref<32x128xbf16, #tpu.memory_space<vmem>>, %arg8: memref<32x128xbf16, #tpu.memory_space<vmem>>, %arg9: memref<32x128xbf16, #tpu.memory_space<vmem>>, %arg10: memref<32x128xbf16, #tpu.memory_space<vmem>>) attributes {dimension_semantics = [#tpu.dimension_semantics<parallel>], iteration_bounds = array<i64: 1>, scalar_prefetch = 0 : i64, scratch_operands = 0 : i64, tpu.core_type = #tpu.core_type<tc>, window_params = [{transform_indices = @transform_0, window_bounds = array<i64: 32, 128>}, {transform_indices = @transform_1, window_bounds = array<i64: 32, 128>}, {transform_indices = @transform_2, window_bounds = array<i64: 32, 128>}, {transform_indices = @transform_3, window_bounds = array<i64: 32, 128>}, {transform_indices = @transform_4, window_bounds = array<i64: 32, 128>}, {transform_indices = @transform_5, window_bounds = array<i64: 32, 128>}, {transform_indices = @transform_6, window_bounds = array<i64: 32, 128>}, {transform_indices = @transform_7, window_bounds = array<i64: 32, 128>}, {transform_indices = @transform_8, window_bounds = array<i64: 32, 128>}, {transform_indices = @transform_9, window_bounds = array<i64: 32, 128>}]} {
    %c0 = arith.constant 0 : index
    %c0_0 = arith.constant 0 : index
    %0 = vector.load %arg1[%c0, %c0_0] : memref<32x128xbf16, #tpu.memory_space<vmem>>, vector<32x128xbf16>
    %c0_1 = arith.constant 0 : index
    %c0_2 = arith.constant 0 : index
    %1 = vector.load %arg2[%c0_1, %c0_2] : memref<32x128xbf16, #tpu.memory_space<vmem>>, vector<32x128xbf16>
    %2 = arith.maximumf %0, %1 : vector<32x128xbf16>
    %c0_3 = arith.constant 0 : index
    %c0_4 = arith.constant 0 : index
    %3 = vector.load %arg3[%c0_3, %c0_4] : memref<32x128xbf16, #tpu.memory_space<vmem>>, vector<32x128xbf16>
    %4 = arith.maximumf %2, %3 : vector<32x128xbf16>
    %c0_5 = arith.constant 0 : index
    %c0_6 = arith.constant 0 : index
    %5 = vector.load %arg4[%c0_5, %c0_6] : memref<32x128xbf16, #tpu.memory_space<vmem>>, vector<32x128xbf16>
    %6 = arith.maximumf %4, %5 : vector<32x128xbf16>
    %c0_7 = arith.constant 0 : index
    %c0_8 = arith.constant 0 : index
    %7 = vector.load %arg5[%c0_7, %c0_8] : memref<32x128xbf16, #tpu.memory_space<vmem>>, vector<32x128xbf16>
    %8 = arith.maximumf %6, %7 : vector<32x128xbf16>
    %c0_9 = arith.constant 0 : index
    %c0_10 = arith.constant 0 : index
    %9 = vector.load %arg6[%c0_9, %c0_10] : memref<32x128xbf16, #tpu.memory_space<vmem>>, vector<32x128xbf16>
    %10 = arith.maximumf %8, %9 : vector<32x128xbf16>
    %c0_11 = arith.constant 0 : index
    %c0_12 = arith.constant 0 : index
    %11 = vector.load %arg7[%c0_11, %c0_12] : memref<32x128xbf16, #tpu.memory_space<vmem>>, vector<32x128xbf16>
    %12 = arith.maximumf %10, %11 : vector<32x128xbf16>
    %c0_13 = arith.constant 0 : index
    %c0_14 = arith.constant 0 : index
    %13 = vector.load %arg8[%c0_13, %c0_14] : memref<32x128xbf16, #tpu.memory_space<vmem>>, vector<32x128xbf16>
    %14 = arith.maximumf %12, %13 : vector<32x128xbf16>
    %c0_15 = arith.constant 0 : index
    %c0_16 = arith.constant 0 : index
    %15 = vector.load %arg9[%c0_15, %c0_16] : memref<32x128xbf16, #tpu.memory_space<vmem>>, vector<32x128xbf16>
    %16 = arith.maximumf %14, %15 : vector<32x128xbf16>
    %c0_17 = arith.constant 0 : index
    %c0_18 = arith.constant 0 : index
    %17 = vector.load %arg10[%c0_17, %c0_18] : memref<32x128xbf16, #tpu.memory_space<vmem>>, vector<32x128xbf16>
    tpu.vector_store %arg10[%c0_17, %c0_18], %16 {strides = array<i32>} : memref<32x128xbf16, #tpu.memory_space<vmem>>, vector<32x128xbf16>,
    return
  }
  func.func @transform_0(%arg0: i32) -> (i32, i32) {
    %c0_i32 = arith.constant 0 : i32
    %c0_i32_0 = arith.constant 0 : i32
    return %arg0, %c0_i32 : i32, i32
  }
  func.func @transform_1(%arg0: i32) -> (i32, i32) {
    %c0_i32 = arith.constant 0 : i32
    %c0_i32_0 = arith.constant 0 : i32
    return %arg0, %c0_i32 : i32, i32
  }
  func.func @transform_2(%arg0: i32) -> (i32, i32) {
    %c0_i32 = arith.constant 0 : i32
    %c0_i32_0 = arith.constant 0 : i32
    return %arg0, %c0_i32 : i32, i32
  }
  func.func @transform_3(%arg0: i32) -> (i32, i32) {
    %c0_i32 = arith.constant 0 : i32
    %c0_i32_0 = arith.constant 0 : i32
    return %arg0, %c0_i32 : i32, i32
  }
  func.func @transform_4(%arg0: i32) -> (i32, i32) {
    %c0_i32 = arith.constant 0 : i32
    %c0_i32_0 = arith.constant 0 : i32
    return %arg0, %c0_i32 : i32, i32
  }
  func.func @transform_5(%arg0: i32) -> (i32, i32) {
    %c0_i32 = arith.constant 0 : i32
    %c0_i32_0 = arith.constant 0 : i32
    return %arg0, %c0_i32 : i32, i32
  }
  func.func @transform_6(%arg0: i32) -> (i32, i32) {
    %c0_i32 = arith.constant 0 : i32
    %c0_i32_0 = arith.constant 0 : i32
    return %arg0, %c0_i32 : i32, i32
  }
  func.func @transform_7(%arg0: i32) -> (i32, i32) {
    %c0_i32 = arith.constant 0 : i32
    %c0_i32_0 = arith.constant 0 : i32
    return %arg0, %c0_i32 : i32, i32
  }
  func.func @transform_8(%arg0: i32) -> (i32, i32) {
    %c0_i32 = arith.constant 0 : i32
    %c0_i32_0 = arith.constant 0 : i32
    return %arg0, %c0_i32 : i32, i32
  }
  func.func @transform_9(%arg0: i32) -> (i32, i32) {
    %c0_i32 = arith.constant 0 : i32
    %c0_i32_0 = arith.constant 0 : i32
    return %arg0, %c0_i32 : i32, i32
  }
}

module attributes {stable_mosaic.version = 11 : i64} {
  func.func @_matmul_bn_kernel(%arg0: i32, %arg1: i32, %arg2: i32, %arg3: memref<32x128xbf16, #tpu.memory_space<vmem>>, %arg4: memref<128x128xbf16, #tpu.memory_space<vmem>>, %arg5: memref<1x128xf32, #tpu.memory_space<vmem>>, %arg6: memref<1x128xf32, #tpu.memory_space<vmem>>, %arg7: memref<32x128xbf16, #tpu.memory_space<vmem>>, %arg8: memref<32x128xf32, #tpu.memory_space<vmem>>) attributes {dimension_semantics = [#tpu.dimension_semantics<parallel>, #tpu.dimension_semantics<parallel>, #tpu.dimension_semantics<arbitrary>], iteration_bounds = array<i64: 1, 1, 1>, scalar_prefetch = 0 : i64, scratch_operands = 1 : i64, tpu.core_type = #tpu.core_type<tc>, window_params = [{transform_indices = @transform_0, window_bounds = array<i64: 32, 128>}, {transform_indices = @transform_1, window_bounds = array<i64: 128, 128>}, {transform_indices = @transform_2, window_bounds = array<i64: 1, 128>}, {transform_indices = @transform_3, window_bounds = array<i64: 1, 128>}, {transform_indices = @transform_4, window_bounds = array<i64: 32, 128>}]} {
    %c0_i32 = arith.constant 0 : i32
    %0 = arith.cmpi eq, %arg2, %c0_i32 : i32
    %1 = arith.extui %0 : i1 to i32
    %c0_i32_0 = arith.constant 0 : i32
    %2 = arith.cmpi ne, %1, %c0_i32_0 : i32
    scf.if %2 {
      %cst_10 = arith.constant 0.000000e+00 : f32
      %12 = vector.broadcast %cst_10 : f32 to vector<32x128xf32>
      %c0_11 = arith.constant 0 : index
      %c0_12 = arith.constant 0 : index
      %13 = vector.load %arg8[%c0_11, %c0_12] : memref<32x128xf32, #tpu.memory_space<vmem>>, vector<32x128xf32>
      tpu.vector_store %arg8[%c0_11, %c0_12], %12 {strides = array<i32>} : memref<32x128xf32, #tpu.memory_space<vmem>>, vector<32x128xf32>,
    } else {
    }
    %c0 = arith.constant 0 : index
    %c0_1 = arith.constant 0 : index
    %3 = vector.load %arg8[%c0, %c0_1] : memref<32x128xf32, #tpu.memory_space<vmem>>, vector<32x128xf32>
    %c0_2 = arith.constant 0 : index
    %c0_3 = arith.constant 0 : index
    %4 = vector.load %arg3[%c0_2, %c0_3] : memref<32x128xbf16, #tpu.memory_space<vmem>>, vector<32x128xbf16>
    %c0_4 = arith.constant 0 : index
    %c0_5 = arith.constant 0 : index
    %5 = vector.load %arg4[%c0_4, %c0_5] : memref<128x128xbf16, #tpu.memory_space<vmem>>, vector<128x128xbf16>
    %cst = arith.constant dense<0.000000e+00> : vector<32x128xf32>
    %6 = tpu.matmul %4, %5, %cst {dimension_numbers = #tpu.dot_dimension_numbers<[1], [0], [0], [1], [0, 0, 1, 1], [], []>} : vector<32x128xbf16>, vector<128x128xbf16>, vector<32x128xf32> -> vector<32x128xf32>
    %7 = arith.addf %3, %6 : vector<32x128xf32>
    %c0_6 = arith.constant 0 : index
    %c0_7 = arith.constant 0 : index
    %8 = vector.load %arg8[%c0_6, %c0_7] : memref<32x128xf32, #tpu.memory_space<vmem>>, vector<32x128xf32>
    tpu.vector_store %arg8[%c0_6, %c0_7], %7 {strides = array<i32>} : memref<32x128xf32, #tpu.memory_space<vmem>>, vector<32x128xf32>,
    %c0_i32_8 = arith.constant 0 : i32
    %9 = arith.cmpi eq, %arg2, %c0_i32_8 : i32
    %10 = arith.extui %9 : i1 to i32
    %c0_i32_9 = arith.constant 0 : i32
    %11 = arith.cmpi ne, %10, %c0_i32_9 : i32
    scf.if %11 {
      %c0_10 = arith.constant 0 : index
      %c0_11 = arith.constant 0 : index
      %12 = vector.load %arg8[%c0_10, %c0_11] : memref<32x128xf32, #tpu.memory_space<vmem>>, vector<32x128xf32>
      %c0_12 = arith.constant 0 : index
      %c0_13 = arith.constant 0 : index
      %13 = vector.load %arg5[%c0_12, %c0_13] : memref<1x128xf32, #tpu.memory_space<vmem>>, vector<1x128xf32>
      %14 = vector.broadcast %13 : vector<1x128xf32> to vector<32x128xf32>
      %15 = arith.mulf %12, %14 : vector<32x128xf32>
      %c0_14 = arith.constant 0 : index
      %c0_15 = arith.constant 0 : index
      %16 = vector.load %arg6[%c0_14, %c0_15] : memref<1x128xf32, #tpu.memory_space<vmem>>, vector<1x128xf32>
      %17 = vector.broadcast %16 : vector<1x128xf32> to vector<32x128xf32>
      %18 = arith.addf %15, %17 : vector<32x128xf32>
      %cst_16 = arith.constant 0.000000e+00 : f32
      %19 = vector.broadcast %cst_16 : f32 to vector<32x128xf32>
      %20 = arith.maximumf %18, %19 : vector<32x128xf32>
      %21 = arith.truncf %20 : vector<32x128xf32> to vector<32x128xbf16>
      %c0_17 = arith.constant 0 : index
      %c0_18 = arith.constant 0 : index
      %22 = vector.load %arg7[%c0_17, %c0_18] : memref<32x128xbf16, #tpu.memory_space<vmem>>, vector<32x128xbf16>
      tpu.vector_store %arg7[%c0_17, %c0_18], %21 {strides = array<i32>} : memref<32x128xbf16, #tpu.memory_space<vmem>>, vector<32x128xbf16>,
    } else {
    }
    return
  }
  func.func @transform_0(%arg0: i32, %arg1: i32, %arg2: i32) -> (i32, i32) {
    %c0_i32 = arith.constant 0 : i32
    return %arg0, %arg2 : i32, i32
  }
  func.func @transform_1(%arg0: i32, %arg1: i32, %arg2: i32) -> (i32, i32) {
    %c0_i32 = arith.constant 0 : i32
    return %arg2, %arg1 : i32, i32
  }
  func.func @transform_2(%arg0: i32, %arg1: i32, %arg2: i32) -> (i32, i32) {
    %c0_i32 = arith.constant 0 : i32
    %c0_i32_0 = arith.constant 0 : i32
    return %c0_i32, %arg1 : i32, i32
  }
  func.func @transform_3(%arg0: i32, %arg1: i32, %arg2: i32) -> (i32, i32) {
    %c0_i32 = arith.constant 0 : i32
    %c0_i32_0 = arith.constant 0 : i32
    return %c0_i32, %arg1 : i32, i32
  }
  func.func @transform_4(%arg0: i32, %arg1: i32, %arg2: i32) -> (i32, i32) {
    %c0_i32 = arith.constant 0 : i32
    return %arg0, %arg1 : i32, i32
  }
}

module attributes {stable_mosaic.version = 11 : i64} {
  func.func @_matmul_bn_res_kernel(%arg0: i32, %arg1: i32, %arg2: i32, %arg3: memref<32x128xbf16, #tpu.memory_space<vmem>>, %arg4: memref<128x256xbf16, #tpu.memory_space<vmem>>, %arg5: memref<1x256xf32, #tpu.memory_space<vmem>>, %arg6: memref<1x256xf32, #tpu.memory_space<vmem>>, %arg7: memref<32x256xbf16, #tpu.memory_space<vmem>>, %arg8: memref<32x256xbf16, #tpu.memory_space<vmem>>, %arg9: memref<32x256xf32, #tpu.memory_space<vmem>>) attributes {dimension_semantics = [#tpu.dimension_semantics<parallel>, #tpu.dimension_semantics<parallel>, #tpu.dimension_semantics<arbitrary>], iteration_bounds = array<i64: 1, 1, 1>, scalar_prefetch = 0 : i64, scratch_operands = 1 : i64, tpu.core_type = #tpu.core_type<tc>, window_params = [{transform_indices = @transform_0, window_bounds = array<i64: 32, 128>}, {transform_indices = @transform_1, window_bounds = array<i64: 128, 256>}, {transform_indices = @transform_2, window_bounds = array<i64: 1, 256>}, {transform_indices = @transform_3, window_bounds = array<i64: 1, 256>}, {transform_indices = @transform_4, window_bounds = array<i64: 32, 256>}, {transform_indices = @transform_5, window_bounds = array<i64: 32, 256>}]} {
    %c0_i32 = arith.constant 0 : i32
    %0 = arith.cmpi eq, %arg2, %c0_i32 : i32
    %1 = arith.extui %0 : i1 to i32
    %c0_i32_0 = arith.constant 0 : i32
    %2 = arith.cmpi ne, %1, %c0_i32_0 : i32
    scf.if %2 {
      %cst_10 = arith.constant 0.000000e+00 : f32
      %12 = vector.broadcast %cst_10 : f32 to vector<32x256xf32>
      %c0_11 = arith.constant 0 : index
      %c0_12 = arith.constant 0 : index
      %13 = vector.load %arg9[%c0_11, %c0_12] : memref<32x256xf32, #tpu.memory_space<vmem>>, vector<32x256xf32>
      tpu.vector_store %arg9[%c0_11, %c0_12], %12 {strides = array<i32>} : memref<32x256xf32, #tpu.memory_space<vmem>>, vector<32x256xf32>,
    } else {
    }
    %c0 = arith.constant 0 : index
    %c0_1 = arith.constant 0 : index
    %3 = vector.load %arg9[%c0, %c0_1] : memref<32x256xf32, #tpu.memory_space<vmem>>, vector<32x256xf32>
    %c0_2 = arith.constant 0 : index
    %c0_3 = arith.constant 0 : index
    %4 = vector.load %arg3[%c0_2, %c0_3] : memref<32x128xbf16, #tpu.memory_space<vmem>>, vector<32x128xbf16>
    %c0_4 = arith.constant 0 : index
    %c0_5 = arith.constant 0 : index
    %5 = vector.load %arg4[%c0_4, %c0_5] : memref<128x256xbf16, #tpu.memory_space<vmem>>, vector<128x256xbf16>
    %cst = arith.constant dense<0.000000e+00> : vector<32x256xf32>
    %6 = tpu.matmul %4, %5, %cst {dimension_numbers = #tpu.dot_dimension_numbers<[1], [0], [0], [1], [0, 0, 1, 1], [], []>} : vector<32x128xbf16>, vector<128x256xbf16>, vector<32x256xf32> -> vector<32x256xf32>
    %7 = arith.addf %3, %6 : vector<32x256xf32>
    %c0_6 = arith.constant 0 : index
    %c0_7 = arith.constant 0 : index
    %8 = vector.load %arg9[%c0_6, %c0_7] : memref<32x256xf32, #tpu.memory_space<vmem>>, vector<32x256xf32>
    tpu.vector_store %arg9[%c0_6, %c0_7], %7 {strides = array<i32>} : memref<32x256xf32, #tpu.memory_space<vmem>>, vector<32x256xf32>,
    %c0_i32_8 = arith.constant 0 : i32
    %9 = arith.cmpi eq, %arg2, %c0_i32_8 : i32
    %10 = arith.extui %9 : i1 to i32
    %c0_i32_9 = arith.constant 0 : i32
    %11 = arith.cmpi ne, %10, %c0_i32_9 : i32
    scf.if %11 {
      %c0_10 = arith.constant 0 : index
      %c0_11 = arith.constant 0 : index
      %12 = vector.load %arg9[%c0_10, %c0_11] : memref<32x256xf32, #tpu.memory_space<vmem>>, vector<32x256xf32>
      %c0_12 = arith.constant 0 : index
      %c0_13 = arith.constant 0 : index
      %13 = vector.load %arg5[%c0_12, %c0_13] : memref<1x256xf32, #tpu.memory_space<vmem>>, vector<1x256xf32>
      %14 = vector.broadcast %13 : vector<1x256xf32> to vector<32x256xf32>
      %15 = arith.mulf %12, %14 : vector<32x256xf32>
      %c0_14 = arith.constant 0 : index
      %c0_15 = arith.constant 0 : index
      %16 = vector.load %arg6[%c0_14, %c0_15] : memref<1x256xf32, #tpu.memory_space<vmem>>, vector<1x256xf32>
      %17 = vector.broadcast %16 : vector<1x256xf32> to vector<32x256xf32>
      %18 = arith.addf %15, %17 : vector<32x256xf32>
      %c0_16 = arith.constant 0 : index
      %c0_17 = arith.constant 0 : index
      %19 = vector.load %arg7[%c0_16, %c0_17] : memref<32x256xbf16, #tpu.memory_space<vmem>>, vector<32x256xbf16>
      %20 = arith.extf %19 : vector<32x256xbf16> to vector<32x256xf32>
      %21 = arith.addf %18, %20 : vector<32x256xf32>
      %cst_18 = arith.constant 0.000000e+00 : f32
      %22 = vector.broadcast %cst_18 : f32 to vector<32x256xf32>
      %23 = arith.maximumf %21, %22 : vector<32x256xf32>
      %24 = arith.truncf %23 : vector<32x256xf32> to vector<32x256xbf16>
      %c0_19 = arith.constant 0 : index
      %c0_20 = arith.constant 0 : index
      %25 = vector.load %arg8[%c0_19, %c0_20] : memref<32x256xbf16, #tpu.memory_space<vmem>>, vector<32x256xbf16>
      tpu.vector_store %arg8[%c0_19, %c0_20], %24 {strides = array<i32>} : memref<32x256xbf16, #tpu.memory_space<vmem>>, vector<32x256xbf16>,
    } else {
    }
    return
  }
  func.func @transform_0(%arg0: i32, %arg1: i32, %arg2: i32) -> (i32, i32) {
    %c0_i32 = arith.constant 0 : i32
    return %arg0, %arg2 : i32, i32
  }
  func.func @transform_1(%arg0: i32, %arg1: i32, %arg2: i32) -> (i32, i32) {
    %c0_i32 = arith.constant 0 : i32
    return %arg2, %arg1 : i32, i32
  }
  func.func @transform_2(%arg0: i32, %arg1: i32, %arg2: i32) -> (i32, i32) {
    %c0_i32 = arith.constant 0 : i32
    %c0_i32_0 = arith.constant 0 : i32
    return %c0_i32, %arg1 : i32, i32
  }
  func.func @transform_3(%arg0: i32, %arg1: i32, %arg2: i32) -> (i32, i32) {
    %c0_i32 = arith.constant 0 : i32
    %c0_i32_0 = arith.constant 0 : i32
    return %c0_i32, %arg1 : i32, i32
  }
  func.func @transform_4(%arg0: i32, %arg1: i32, %arg2: i32) -> (i32, i32) {
    %c0_i32 = arith.constant 0 : i32
    return %arg0, %arg1 : i32, i32
  }
  func.func @transform_5(%arg0: i32, %arg1: i32, %arg2: i32) -> (i32, i32) {
    %c0_i32 = arith.constant 0 : i32
    return %arg0, %arg1 : i32, i32
  }
}

module attributes {stable_mosaic.version = 11 : i64} {
  func.func @_matmul_bn_kernel(%arg0: i32, %arg1: i32, %arg2: i32, %arg3: memref<32x128xbf16, #tpu.memory_space<vmem>>, %arg4: memref<128x256xbf16, #tpu.memory_space<vmem>>, %arg5: memref<1x256xf32, #tpu.memory_space<vmem>>, %arg6: memref<1x256xf32, #tpu.memory_space<vmem>>, %arg7: memref<32x256xbf16, #tpu.memory_space<vmem>>, %arg8: memref<32x256xf32, #tpu.memory_space<vmem>>) attributes {dimension_semantics = [#tpu.dimension_semantics<parallel>, #tpu.dimension_semantics<parallel>, #tpu.dimension_semantics<arbitrary>], iteration_bounds = array<i64: 1, 1, 1>, scalar_prefetch = 0 : i64, scratch_operands = 1 : i64, tpu.core_type = #tpu.core_type<tc>, window_params = [{transform_indices = @transform_0, window_bounds = array<i64: 32, 128>}, {transform_indices = @transform_1, window_bounds = array<i64: 128, 256>}, {transform_indices = @transform_2, window_bounds = array<i64: 1, 256>}, {transform_indices = @transform_3, window_bounds = array<i64: 1, 256>}, {transform_indices = @transform_4, window_bounds = array<i64: 32, 256>}]} {
    %c0_i32 = arith.constant 0 : i32
    %0 = arith.cmpi eq, %arg2, %c0_i32 : i32
    %1 = arith.extui %0 : i1 to i32
    %c0_i32_0 = arith.constant 0 : i32
    %2 = arith.cmpi ne, %1, %c0_i32_0 : i32
    scf.if %2 {
      %cst_10 = arith.constant 0.000000e+00 : f32
      %12 = vector.broadcast %cst_10 : f32 to vector<32x256xf32>
      %c0_11 = arith.constant 0 : index
      %c0_12 = arith.constant 0 : index
      %13 = vector.load %arg8[%c0_11, %c0_12] : memref<32x256xf32, #tpu.memory_space<vmem>>, vector<32x256xf32>
      tpu.vector_store %arg8[%c0_11, %c0_12], %12 {strides = array<i32>} : memref<32x256xf32, #tpu.memory_space<vmem>>, vector<32x256xf32>,
    } else {
    }
    %c0 = arith.constant 0 : index
    %c0_1 = arith.constant 0 : index
    %3 = vector.load %arg8[%c0, %c0_1] : memref<32x256xf32, #tpu.memory_space<vmem>>, vector<32x256xf32>
    %c0_2 = arith.constant 0 : index
    %c0_3 = arith.constant 0 : index
    %4 = vector.load %arg3[%c0_2, %c0_3] : memref<32x128xbf16, #tpu.memory_space<vmem>>, vector<32x128xbf16>
    %c0_4 = arith.constant 0 : index
    %c0_5 = arith.constant 0 : index
    %5 = vector.load %arg4[%c0_4, %c0_5] : memref<128x256xbf16, #tpu.memory_space<vmem>>, vector<128x256xbf16>
    %cst = arith.constant dense<0.000000e+00> : vector<32x256xf32>
    %6 = tpu.matmul %4, %5, %cst {dimension_numbers = #tpu.dot_dimension_numbers<[1], [0], [0], [1], [0, 0, 1, 1], [], []>} : vector<32x128xbf16>, vector<128x256xbf16>, vector<32x256xf32> -> vector<32x256xf32>
    %7 = arith.addf %3, %6 : vector<32x256xf32>
    %c0_6 = arith.constant 0 : index
    %c0_7 = arith.constant 0 : index
    %8 = vector.load %arg8[%c0_6, %c0_7] : memref<32x256xf32, #tpu.memory_space<vmem>>, vector<32x256xf32>
    tpu.vector_store %arg8[%c0_6, %c0_7], %7 {strides = array<i32>} : memref<32x256xf32, #tpu.memory_space<vmem>>, vector<32x256xf32>,
    %c0_i32_8 = arith.constant 0 : i32
    %9 = arith.cmpi eq, %arg2, %c0_i32_8 : i32
    %10 = arith.extui %9 : i1 to i32
    %c0_i32_9 = arith.constant 0 : i32
    %11 = arith.cmpi ne, %10, %c0_i32_9 : i32
    scf.if %11 {
      %c0_10 = arith.constant 0 : index
      %c0_11 = arith.constant 0 : index
      %12 = vector.load %arg8[%c0_10, %c0_11] : memref<32x256xf32, #tpu.memory_space<vmem>>, vector<32x256xf32>
      %c0_12 = arith.constant 0 : index
      %c0_13 = arith.constant 0 : index
      %13 = vector.load %arg5[%c0_12, %c0_13] : memref<1x256xf32, #tpu.memory_space<vmem>>, vector<1x256xf32>
      %14 = vector.broadcast %13 : vector<1x256xf32> to vector<32x256xf32>
      %15 = arith.mulf %12, %14 : vector<32x256xf32>
      %c0_14 = arith.constant 0 : index
      %c0_15 = arith.constant 0 : index
      %16 = vector.load %arg6[%c0_14, %c0_15] : memref<1x256xf32, #tpu.memory_space<vmem>>, vector<1x256xf32>
      %17 = vector.broadcast %16 : vector<1x256xf32> to vector<32x256xf32>
      %18 = arith.addf %15, %17 : vector<32x256xf32>
      %19 = arith.truncf %18 : vector<32x256xf32> to vector<32x256xbf16>
      %c0_16 = arith.constant 0 : index
      %c0_17 = arith.constant 0 : index
      %20 = vector.load %arg7[%c0_16, %c0_17] : memref<32x256xbf16, #tpu.memory_space<vmem>>, vector<32x256xbf16>
      tpu.vector_store %arg7[%c0_16, %c0_17], %19 {strides = array<i32>} : memref<32x256xbf16, #tpu.memory_space<vmem>>, vector<32x256xbf16>,
    } else {
    }
    return
  }
  func.func @transform_0(%arg0: i32, %arg1: i32, %arg2: i32) -> (i32, i32) {
    %c0_i32 = arith.constant 0 : i32
    return %arg0, %arg2 : i32, i32
  }
  func.func @transform_1(%arg0: i32, %arg1: i32, %arg2: i32) -> (i32, i32) {
    %c0_i32 = arith.constant 0 : i32
    return %arg2, %arg1 : i32, i32
  }
  func.func @transform_2(%arg0: i32, %arg1: i32, %arg2: i32) -> (i32, i32) {
    %c0_i32 = arith.constant 0 : i32
    %c0_i32_0 = arith.constant 0 : i32
    return %c0_i32, %arg1 : i32, i32
  }
  func.func @transform_3(%arg0: i32, %arg1: i32, %arg2: i32) -> (i32, i32) {
    %c0_i32 = arith.constant 0 : i32
    %c0_i32_0 = arith.constant 0 : i32
    return %c0_i32, %arg1 : i32, i32
  }
  func.func @transform_4(%arg0: i32, %arg1: i32, %arg2: i32) -> (i32, i32) {
    %c0_i32 = arith.constant 0 : i32
    return %arg0, %arg1 : i32, i32
  }
}

module attributes {stable_mosaic.version = 11 : i64} {
  func.func @_conv3x3_kernel(%arg0: i32, %arg1: i32, %arg2: i32, %arg3: memref<1x1x6x128xbf16, #tpu.memory_space<vmem>>, %arg4: memref<1x1x6x128xbf16, #tpu.memory_space<vmem>>, %arg5: memref<1x1x6x128xbf16, #tpu.memory_space<vmem>>, %arg6: memref<3x3x128x128xbf16, #tpu.memory_space<vmem>>, %arg7: memref<1x128xf32, #tpu.memory_space<vmem>>, %arg8: memref<1x128xf32, #tpu.memory_space<vmem>>, %arg9: memref<1x1x4x128xbf16, #tpu.memory_space<vmem>>) attributes {dimension_semantics = [#tpu.dimension_semantics<parallel>, #tpu.dimension_semantics<parallel>, #tpu.dimension_semantics<parallel>], iteration_bounds = array<i64: 2, 1, 4>, scalar_prefetch = 0 : i64, scratch_operands = 0 : i64, tpu.core_type = #tpu.core_type<tc>, window_params = [{transform_indices = @transform_0, window_bounds = array<i64: 1, 1, 6, 128>}, {transform_indices = @transform_1, window_bounds = array<i64: 1, 1, 6, 128>}, {transform_indices = @transform_2, window_bounds = array<i64: 1, 1, 6, 128>}, {transform_indices = @transform_3, window_bounds = array<i64: 3, 3, 128, 128>}, {transform_indices = @transform_4, window_bounds = array<i64: 1, 128>}, {transform_indices = @transform_5, window_bounds = array<i64: 1, 128>}, {transform_indices = @transform_6, window_bounds = array<i64: 1, 1, 4, 128>}]} {
    %cst = arith.constant 0.000000e+00 : f32
    %0 = vector.broadcast %cst : f32 to vector<4x128xf32>
    %c0 = arith.constant 0 : index
    %c0_0 = arith.constant 0 : index
    %c0_1 = arith.constant 0 : index
    %c0_2 = arith.constant 0 : index
    %1 = vector.load %arg3[%c0, %c0_0, %c0_1, %c0_2] : memref<1x1x6x128xbf16, #tpu.memory_space<vmem>>, vector<1x1x6x128xbf16>
    %2 = vector.shape_cast %1 : vector<1x1x6x128xbf16> to vector<6x128xbf16>
    %3 = vector.extract_strided_slice %2 {offsets = [0, 0], sizes = [4, 128], strides = [1, 1]} : vector<6x128xbf16> to vector<4x128xbf16>
    %c0_3 = arith.constant 0 : index
    %c0_4 = arith.constant 0 : index
    %c0_5 = arith.constant 0 : index
    %c0_6 = arith.constant 0 : index
    %4 = vector.load %arg6[%c0_3, %c0_4, %c0_5, %c0_6] : memref<3x3x128x128xbf16, #tpu.memory_space<vmem>>, vector<1x1x128x128xbf16>
    %5 = vector.shape_cast %4 : vector<1x1x128x128xbf16> to vector<128x128xbf16>
    %cst_7 = arith.constant dense<0.000000e+00> : vector<4x128xf32>
    %6 = tpu.matmul %3, %5, %cst_7 {dimension_numbers = #tpu.dot_dimension_numbers<[1], [0], [0], [1], [0, 0, 1, 1], [], []>} : vector<4x128xbf16>, vector<128x128xbf16>, vector<4x128xf32> -> vector<4x128xf32>
    %7 = arith.addf %0, %6 : vector<4x128xf32>
    %8 = vector.extract_strided_slice %2 {offsets = [1, 0], sizes = [4, 128], strides = [1, 1]} : vector<6x128xbf16> to vector<4x128xbf16>
    %c0_8 = arith.constant 0 : index
    %c1 = arith.constant 1 : index
    %c0_9 = arith.constant 0 : index
    %c0_10 = arith.constant 0 : index
    %9 = vector.load %arg6[%c0_8, %c1, %c0_9, %c0_10] : memref<3x3x128x128xbf16, #tpu.memory_space<vmem>>, vector<1x1x128x128xbf16>
    %10 = vector.shape_cast %9 : vector<1x1x128x128xbf16> to vector<128x128xbf16>
    %cst_11 = arith.constant dense<0.000000e+00> : vector<4x128xf32>
    %11 = tpu.matmul %8, %10, %cst_11 {dimension_numbers = #tpu.dot_dimension_numbers<[1], [0], [0], [1], [0, 0, 1, 1], [], []>} : vector<4x128xbf16>, vector<128x128xbf16>, vector<4x128xf32> -> vector<4x128xf32>
    %12 = arith.addf %7, %11 : vector<4x128xf32>
    %13 = vector.extract_strided_slice %2 {offsets = [2, 0], sizes = [4, 128], strides = [1, 1]} : vector<6x128xbf16> to vector<4x128xbf16>
    %c0_12 = arith.constant 0 : index
    %c2 = arith.constant 2 : index
    %c0_13 = arith.constant 0 : index
    %c0_14 = arith.constant 0 : index
    %14 = vector.load %arg6[%c0_12, %c2, %c0_13, %c0_14] : memref<3x3x128x128xbf16, #tpu.memory_space<vmem>>, vector<1x1x128x128xbf16>
    %15 = vector.shape_cast %14 : vector<1x1x128x128xbf16> to vector<128x128xbf16>
    %cst_15 = arith.constant dense<0.000000e+00> : vector<4x128xf32>
    %16 = tpu.matmul %13, %15, %cst_15 {dimension_numbers = #tpu.dot_dimension_numbers<[1], [0], [0], [1], [0, 0, 1, 1], [], []>} : vector<4x128xbf16>, vector<128x128xbf16>, vector<4x128xf32> -> vector<4x128xf32>
    %17 = arith.addf %12, %16 : vector<4x128xf32>
    %c0_16 = arith.constant 0 : index
    %c0_17 = arith.constant 0 : index
    %c0_18 = arith.constant 0 : index
    %c0_19 = arith.constant 0 : index
    %18 = vector.load %arg4[%c0_16, %c0_17, %c0_18, %c0_19] : memref<1x1x6x128xbf16, #tpu.memory_space<vmem>>, vector<1x1x6x128xbf16>
    %19 = vector.shape_cast %18 : vector<1x1x6x128xbf16> to vector<6x128xbf16>
    %20 = vector.extract_strided_slice %19 {offsets = [0, 0], sizes = [4, 128], strides = [1, 1]} : vector<6x128xbf16> to vector<4x128xbf16>
    %c1_20 = arith.constant 1 : index
    %c0_21 = arith.constant 0 : index
    %c0_22 = arith.constant 0 : index
    %c0_23 = arith.constant 0 : index
    %21 = vector.load %arg6[%c1_20, %c0_21, %c0_22, %c0_23] : memref<3x3x128x128xbf16, #tpu.memory_space<vmem>>, vector<1x1x128x128xbf16>
    %22 = vector.shape_cast %21 : vector<1x1x128x128xbf16> to vector<128x128xbf16>
    %cst_24 = arith.constant dense<0.000000e+00> : vector<4x128xf32>
    %23 = tpu.matmul %20, %22, %cst_24 {dimension_numbers = #tpu.dot_dimension_numbers<[1], [0], [0], [1], [0, 0, 1, 1], [], []>} : vector<4x128xbf16>, vector<128x128xbf16>, vector<4x128xf32> -> vector<4x128xf32>
    %24 = arith.addf %17, %23 : vector<4x128xf32>
    %25 = vector.extract_strided_slice %19 {offsets = [1, 0], sizes = [4, 128], strides = [1, 1]} : vector<6x128xbf16> to vector<4x128xbf16>
    %c1_25 = arith.constant 1 : index
    %c1_26 = arith.constant 1 : index
    %c0_27 = arith.constant 0 : index
    %c0_28 = arith.constant 0 : index
    %26 = vector.load %arg6[%c1_25, %c1_26, %c0_27, %c0_28] : memref<3x3x128x128xbf16, #tpu.memory_space<vmem>>, vector<1x1x128x128xbf16>
    %27 = vector.shape_cast %26 : vector<1x1x128x128xbf16> to vector<128x128xbf16>
    %cst_29 = arith.constant dense<0.000000e+00> : vector<4x128xf32>
    %28 = tpu.matmul %25, %27, %cst_29 {dimension_numbers = #tpu.dot_dimension_numbers<[1], [0], [0], [1], [0, 0, 1, 1], [], []>} : vector<4x128xbf16>, vector<128x128xbf16>, vector<4x128xf32> -> vector<4x128xf32>
    %29 = arith.addf %24, %28 : vector<4x128xf32>
    %30 = vector.extract_strided_slice %19 {offsets = [2, 0], sizes = [4, 128], strides = [1, 1]} : vector<6x128xbf16> to vector<4x128xbf16>
    %c1_30 = arith.constant 1 : index
    %c2_31 = arith.constant 2 : index
    %c0_32 = arith.constant 0 : index
    %c0_33 = arith.constant 0 : index
    %31 = vector.load %arg6[%c1_30, %c2_31, %c0_32, %c0_33] : memref<3x3x128x128xbf16, #tpu.memory_space<vmem>>, vector<1x1x128x128xbf16>
    %32 = vector.shape_cast %31 : vector<1x1x128x128xbf16> to vector<128x128xbf16>
    %cst_34 = arith.constant dense<0.000000e+00> : vector<4x128xf32>
    %33 = tpu.matmul %30, %32, %cst_34 {dimension_numbers = #tpu.dot_dimension_numbers<[1], [0], [0], [1], [0, 0, 1, 1], [], []>} : vector<4x128xbf16>, vector<128x128xbf16>, vector<4x128xf32> -> vector<4x128xf32>
    %34 = arith.addf %29, %33 : vector<4x128xf32>
    %c0_35 = arith.constant 0 : index
    %c0_36 = arith.constant 0 : index
    %c0_37 = arith.constant 0 : index
    %c0_38 = arith.constant 0 : index
    %35 = vector.load %arg5[%c0_35, %c0_36, %c0_37, %c0_38] : memref<1x1x6x128xbf16, #tpu.memory_space<vmem>>, vector<1x1x6x128xbf16>
    %36 = vector.shape_cast %35 : vector<1x1x6x128xbf16> to vector<6x128xbf16>
    %37 = vector.extract_strided_slice %36 {offsets = [0, 0], sizes = [4, 128], strides = [1, 1]} : vector<6x128xbf16> to vector<4x128xbf16>
    %c2_39 = arith.constant 2 : index
    %c0_40 = arith.constant 0 : index
    %c0_41 = arith.constant 0 : index
    %c0_42 = arith.constant 0 : index
    %38 = vector.load %arg6[%c2_39, %c0_40, %c0_41, %c0_42] : memref<3x3x128x128xbf16, #tpu.memory_space<vmem>>, vector<1x1x128x128xbf16>
    %39 = vector.shape_cast %38 : vector<1x1x128x128xbf16> to vector<128x128xbf16>
    %cst_43 = arith.constant dense<0.000000e+00> : vector<4x128xf32>
    %40 = tpu.matmul %37, %39, %cst_43 {dimension_numbers = #tpu.dot_dimension_numbers<[1], [0], [0], [1], [0, 0, 1, 1], [], []>} : vector<4x128xbf16>, vector<128x128xbf16>, vector<4x128xf32> -> vector<4x128xf32>
    %41 = arith.addf %34, %40 : vector<4x128xf32>
    %42 = vector.extract_strided_slice %36 {offsets = [1, 0], sizes = [4, 128], strides = [1, 1]} : vector<6x128xbf16> to vector<4x128xbf16>
    %c2_44 = arith.constant 2 : index
    %c1_45 = arith.constant 1 : index
    %c0_46 = arith.constant 0 : index
    %c0_47 = arith.constant 0 : index
    %43 = vector.load %arg6[%c2_44, %c1_45, %c0_46, %c0_47] : memref<3x3x128x128xbf16, #tpu.memory_space<vmem>>, vector<1x1x128x128xbf16>
    %44 = vector.shape_cast %43 : vector<1x1x128x128xbf16> to vector<128x128xbf16>
    %cst_48 = arith.constant dense<0.000000e+00> : vector<4x128xf32>
    %45 = tpu.matmul %42, %44, %cst_48 {dimension_numbers = #tpu.dot_dimension_numbers<[1], [0], [0], [1], [0, 0, 1, 1], [], []>} : vector<4x128xbf16>, vector<128x128xbf16>, vector<4x128xf32> -> vector<4x128xf32>
    %46 = arith.addf %41, %45 : vector<4x128xf32>
    %47 = vector.extract_strided_slice %36 {offsets = [2, 0], sizes = [4, 128], strides = [1, 1]} : vector<6x128xbf16> to vector<4x128xbf16>
    %c2_49 = arith.constant 2 : index
    %c2_50 = arith.constant 2 : index
    %c0_51 = arith.constant 0 : index
    %c0_52 = arith.constant 0 : index
    %48 = vector.load %arg6[%c2_49, %c2_50, %c0_51, %c0_52] : memref<3x3x128x128xbf16, #tpu.memory_space<vmem>>, vector<1x1x128x128xbf16>
    %49 = vector.shape_cast %48 : vector<1x1x128x128xbf16> to vector<128x128xbf16>
    %cst_53 = arith.constant dense<0.000000e+00> : vector<4x128xf32>
    %50 = tpu.matmul %47, %49, %cst_53 {dimension_numbers = #tpu.dot_dimension_numbers<[1], [0], [0], [1], [0, 0, 1, 1], [], []>} : vector<4x128xbf16>, vector<128x128xbf16>, vector<4x128xf32> -> vector<4x128xf32>
    %51 = arith.addf %46, %50 : vector<4x128xf32>
    %c0_54 = arith.constant 0 : index
    %c0_55 = arith.constant 0 : index
    %52 = vector.load %arg7[%c0_54, %c0_55] : memref<1x128xf32, #tpu.memory_space<vmem>>, vector<1x128xf32>
    %53 = vector.broadcast %52 : vector<1x128xf32> to vector<4x128xf32>
    %54 = arith.mulf %51, %53 : vector<4x128xf32>
    %c0_56 = arith.constant 0 : index
    %c0_57 = arith.constant 0 : index
    %55 = vector.load %arg8[%c0_56, %c0_57] : memref<1x128xf32, #tpu.memory_space<vmem>>, vector<1x128xf32>
    %56 = vector.broadcast %55 : vector<1x128xf32> to vector<4x128xf32>
    %57 = arith.addf %54, %56 : vector<4x128xf32>
    %cst_58 = arith.constant 0.000000e+00 : f32
    %58 = vector.broadcast %cst_58 : f32 to vector<4x128xf32>
    %59 = arith.maximumf %57, %58 : vector<4x128xf32>
    %60 = arith.truncf %59 : vector<4x128xf32> to vector<4x128xbf16>
    %c0_59 = arith.constant 0 : index
    %c0_60 = arith.constant 0 : index
    %c0_61 = arith.constant 0 : index
    %c0_62 = arith.constant 0 : index
    %61 = vector.load %arg9[%c0_59, %c0_60, %c0_61, %c0_62] : memref<1x1x4x128xbf16, #tpu.memory_space<vmem>>, vector<1x1x4x128xbf16>
    %62 = vector.shape_cast %61 : vector<1x1x4x128xbf16> to vector<4x128xbf16>
    %63 = vector.shape_cast %60 : vector<4x128xbf16> to vector<1x1x4x128xbf16>
    tpu.vector_store %arg9[%c0_59, %c0_60, %c0_61, %c0_62], %63 {strides = array<i32>} : memref<1x1x4x128xbf16, #tpu.memory_space<vmem>>, vector<1x1x4x128xbf16>,
    return
  }
  func.func @transform_0(%arg0: i32, %arg1: i32, %arg2: i32) -> (i32, i32, i32, i32) {
    %c0_i32 = arith.constant 0 : i32
    %0 = arith.addi %arg2, %c0_i32 : i32
    %c0_i32_0 = arith.constant 0 : i32
    %c0_i32_1 = arith.constant 0 : i32
    %c0_i32_2 = arith.constant 0 : i32
    return %arg0, %0, %c0_i32_0, %c0_i32_1 : i32, i32, i32, i32
  }
  func.func @transform_1(%arg0: i32, %arg1: i32, %arg2: i32) -> (i32, i32, i32, i32) {
    %c1_i32 = arith.constant 1 : i32
    %0 = arith.addi %arg2, %c1_i32 : i32
    %c0_i32 = arith.constant 0 : i32
    %c0_i32_0 = arith.constant 0 : i32
    %c0_i32_1 = arith.constant 0 : i32
    return %arg0, %0, %c0_i32, %c0_i32_0 : i32, i32, i32, i32
  }
  func.func @transform_2(%arg0: i32, %arg1: i32, %arg2: i32) -> (i32, i32, i32, i32) {
    %c2_i32 = arith.constant 2 : i32
    %0 = arith.addi %arg2, %c2_i32 : i32
    %c0_i32 = arith.constant 0 : i32
    %c0_i32_0 = arith.constant 0 : i32
    %c0_i32_1 = arith.constant 0 : i32
    return %arg0, %0, %c0_i32, %c0_i32_0 : i32, i32, i32, i32
  }
  func.func @transform_3(%arg0: i32, %arg1: i32, %arg2: i32) -> (i32, i32, i32, i32) {
    %c0_i32 = arith.constant 0 : i32
    %c0_i32_0 = arith.constant 0 : i32
    %c0_i32_1 = arith.constant 0 : i32
    %c0_i32_2 = arith.constant 0 : i32
    return %c0_i32, %c0_i32_0, %c0_i32_1, %arg1 : i32, i32, i32, i32
  }
  func.func @transform_4(%arg0: i32, %arg1: i32, %arg2: i32) -> (i32, i32) {
    %c0_i32 = arith.constant 0 : i32
    %c0_i32_0 = arith.constant 0 : i32
    return %c0_i32, %arg1 : i32, i32
  }
  func.func @transform_5(%arg0: i32, %arg1: i32, %arg2: i32) -> (i32, i32) {
    %c0_i32 = arith.constant 0 : i32
    %c0_i32_0 = arith.constant 0 : i32
    return %c0_i32, %arg1 : i32, i32
  }
  func.func @transform_6(%arg0: i32, %arg1: i32, %arg2: i32) -> (i32, i32, i32, i32) {
    %c0_i32 = arith.constant 0 : i32
    %c0_i32_0 = arith.constant 0 : i32
    return %arg0, %arg2, %c0_i32, %arg1 : i32, i32, i32, i32
  }
}

module attributes {stable_mosaic.version = 11 : i64} {
  func.func @_matmul_bn_kernel(%arg0: i32, %arg1: i32, %arg2: i32, %arg3: memref<32x256xbf16, #tpu.memory_space<vmem>>, %arg4: memref<256x128xbf16, #tpu.memory_space<vmem>>, %arg5: memref<1x128xf32, #tpu.memory_space<vmem>>, %arg6: memref<1x128xf32, #tpu.memory_space<vmem>>, %arg7: memref<32x128xbf16, #tpu.memory_space<vmem>>, %arg8: memref<32x128xf32, #tpu.memory_space<vmem>>) attributes {dimension_semantics = [#tpu.dimension_semantics<parallel>, #tpu.dimension_semantics<parallel>, #tpu.dimension_semantics<arbitrary>], iteration_bounds = array<i64: 1, 1, 1>, scalar_prefetch = 0 : i64, scratch_operands = 1 : i64, tpu.core_type = #tpu.core_type<tc>, window_params = [{transform_indices = @transform_0, window_bounds = array<i64: 32, 256>}, {transform_indices = @transform_1, window_bounds = array<i64: 256, 128>}, {transform_indices = @transform_2, window_bounds = array<i64: 1, 128>}, {transform_indices = @transform_3, window_bounds = array<i64: 1, 128>}, {transform_indices = @transform_4, window_bounds = array<i64: 32, 128>}]} {
    %c0_i32 = arith.constant 0 : i32
    %0 = arith.cmpi eq, %arg2, %c0_i32 : i32
    %1 = arith.extui %0 : i1 to i32
    %c0_i32_0 = arith.constant 0 : i32
    %2 = arith.cmpi ne, %1, %c0_i32_0 : i32
    scf.if %2 {
      %cst_10 = arith.constant 0.000000e+00 : f32
      %12 = vector.broadcast %cst_10 : f32 to vector<32x128xf32>
      %c0_11 = arith.constant 0 : index
      %c0_12 = arith.constant 0 : index
      %13 = vector.load %arg8[%c0_11, %c0_12] : memref<32x128xf32, #tpu.memory_space<vmem>>, vector<32x128xf32>
      tpu.vector_store %arg8[%c0_11, %c0_12], %12 {strides = array<i32>} : memref<32x128xf32, #tpu.memory_space<vmem>>, vector<32x128xf32>,
    } else {
    }
    %c0 = arith.constant 0 : index
    %c0_1 = arith.constant 0 : index
    %3 = vector.load %arg8[%c0, %c0_1] : memref<32x128xf32, #tpu.memory_space<vmem>>, vector<32x128xf32>
    %c0_2 = arith.constant 0 : index
    %c0_3 = arith.constant 0 : index
    %4 = vector.load %arg3[%c0_2, %c0_3] : memref<32x256xbf16, #tpu.memory_space<vmem>>, vector<32x256xbf16>
    %c0_4 = arith.constant 0 : index
    %c0_5 = arith.constant 0 : index
    %5 = vector.load %arg4[%c0_4, %c0_5] : memref<256x128xbf16, #tpu.memory_space<vmem>>, vector<256x128xbf16>
    %cst = arith.constant dense<0.000000e+00> : vector<32x128xf32>
    %6 = tpu.matmul %4, %5, %cst {dimension_numbers = #tpu.dot_dimension_numbers<[1], [0], [0], [1], [0, 0, 1, 1], [], []>} : vector<32x256xbf16>, vector<256x128xbf16>, vector<32x128xf32> -> vector<32x128xf32>
    %7 = arith.addf %3, %6 : vector<32x128xf32>
    %c0_6 = arith.constant 0 : index
    %c0_7 = arith.constant 0 : index
    %8 = vector.load %arg8[%c0_6, %c0_7] : memref<32x128xf32, #tpu.memory_space<vmem>>, vector<32x128xf32>
    tpu.vector_store %arg8[%c0_6, %c0_7], %7 {strides = array<i32>} : memref<32x128xf32, #tpu.memory_space<vmem>>, vector<32x128xf32>,
    %c0_i32_8 = arith.constant 0 : i32
    %9 = arith.cmpi eq, %arg2, %c0_i32_8 : i32
    %10 = arith.extui %9 : i1 to i32
    %c0_i32_9 = arith.constant 0 : i32
    %11 = arith.cmpi ne, %10, %c0_i32_9 : i32
    scf.if %11 {
      %c0_10 = arith.constant 0 : index
      %c0_11 = arith.constant 0 : index
      %12 = vector.load %arg8[%c0_10, %c0_11] : memref<32x128xf32, #tpu.memory_space<vmem>>, vector<32x128xf32>
      %c0_12 = arith.constant 0 : index
      %c0_13 = arith.constant 0 : index
      %13 = vector.load %arg5[%c0_12, %c0_13] : memref<1x128xf32, #tpu.memory_space<vmem>>, vector<1x128xf32>
      %14 = vector.broadcast %13 : vector<1x128xf32> to vector<32x128xf32>
      %15 = arith.mulf %12, %14 : vector<32x128xf32>
      %c0_14 = arith.constant 0 : index
      %c0_15 = arith.constant 0 : index
      %16 = vector.load %arg6[%c0_14, %c0_15] : memref<1x128xf32, #tpu.memory_space<vmem>>, vector<1x128xf32>
      %17 = vector.broadcast %16 : vector<1x128xf32> to vector<32x128xf32>
      %18 = arith.addf %15, %17 : vector<32x128xf32>
      %cst_16 = arith.constant 0.000000e+00 : f32
      %19 = vector.broadcast %cst_16 : f32 to vector<32x128xf32>
      %20 = arith.maximumf %18, %19 : vector<32x128xf32>
      %21 = arith.truncf %20 : vector<32x128xf32> to vector<32x128xbf16>
      %c0_17 = arith.constant 0 : index
      %c0_18 = arith.constant 0 : index
      %22 = vector.load %arg7[%c0_17, %c0_18] : memref<32x128xbf16, #tpu.memory_space<vmem>>, vector<32x128xbf16>
      tpu.vector_store %arg7[%c0_17, %c0_18], %21 {strides = array<i32>} : memref<32x128xbf16, #tpu.memory_space<vmem>>, vector<32x128xbf16>,
    } else {
    }
    return
  }
  func.func @transform_0(%arg0: i32, %arg1: i32, %arg2: i32) -> (i32, i32) {
    %c0_i32 = arith.constant 0 : i32
    return %arg0, %arg2 : i32, i32
  }
  func.func @transform_1(%arg0: i32, %arg1: i32, %arg2: i32) -> (i32, i32) {
    %c0_i32 = arith.constant 0 : i32
    return %arg2, %arg1 : i32, i32
  }
  func.func @transform_2(%arg0: i32, %arg1: i32, %arg2: i32) -> (i32, i32) {
    %c0_i32 = arith.constant 0 : i32
    %c0_i32_0 = arith.constant 0 : i32
    return %c0_i32, %arg1 : i32, i32
  }
  func.func @transform_3(%arg0: i32, %arg1: i32, %arg2: i32) -> (i32, i32) {
    %c0_i32 = arith.constant 0 : i32
    %c0_i32_0 = arith.constant 0 : i32
    return %c0_i32, %arg1 : i32, i32
  }
  func.func @transform_4(%arg0: i32, %arg1: i32, %arg2: i32) -> (i32, i32) {
    %c0_i32 = arith.constant 0 : i32
    return %arg0, %arg1 : i32, i32
  }
}

</mosaic_0001>

<bundles_post_ra>
// kernel: _lambda_.13
= control target key start
LH: loop header
LB: loop body
LE: loop exit
PB: predicated region body
PF: predicated region fallthrough
CT: control target
= control target key end

     0   :  { %s406_s0 = inlined_call_operand.vmem [shape: bf16[32,128], index: 0, kind: input, shape index: {}]   ;;  %s407_s1 = inlined_call_operand.vmem [shape: bf16[32,128], index: 1, kind: input, shape index: {}]   ;;  %s408_s2 = inlined_call_operand.vmem [shape: bf16[32,128], index: 2, kind: input, shape index: {}]   ;;  %s409_s3 = inlined_call_operand.vmem [shape: bf16[32,128], index: 3, kind: input, shape index: {}]   ;;  %s410_s4 = inlined_call_operand.vmem [shape: bf16[32,128], index: 4, kind: input, shape index: {}]   ;;  %s411_s5 = inlined_call_operand.vmem [shape: bf16[32,128], index: 5, kind: input, shape index: {}]   ;;  %s412_s6 = inlined_call_operand.vmem [shape: bf16[32,128], index: 6, kind: input, shape index: {}]   ;;  %s413_s7 = inlined_call_operand.vmem [shape: bf16[32,128], index: 7, kind: input, shape index: {}]   ;;  %s414_s8 = inlined_call_operand.vmem [shape: bf16[32,128], index: 8, kind: input, shape index: {}]   ;;  %s415_s9 = inlined_call_operand.vmem [shape: bf16[32,128], index: 9, kind: output, shape index: {}]  }
   0x1   :  { %v205_v0 = vld [vmem:[%s406_s0] sm:$0xff]   ;;  %v286_v17 = vld [vmem:[%s406_s0 + $0x8] sm:$0xff]  }
   0x2   :  { %v213_v1 = vld [vmem:[%s407_s1] sm:$0xff]   ;;  %v206_v3 = vunpack.c.l.bf16 %v205_v0  ;;  %v207_v4 = vunpack.c.h.bf16 %v205_v0  ;;  %v287_v20 = vld [vmem:[%s407_s1 + $0x8] sm:$0xff]   ;;  %v210_v29 = vunpack.c.l.bf16 %v286_v17  ;;  %v211_v30 = vunpack.c.h.bf16 %v286_v17 }
   0x3   :  { %v221_v2 = vld [vmem:[%s408_s2] sm:$0xff]   ;;  %v214_v5 = vunpack.c.l.bf16 %v213_v1  ;;  %v215_v6 = vunpack.c.h.bf16 %v213_v1  ;;  %v288_v25 = vld [vmem:[%s408_s2 + $0x8] sm:$0xff]   ;;  %v218_v34 = vunpack.c.l.bf16 %v287_v20  ;;  %v219_v35 = vunpack.c.h.bf16 %v287_v20 }
   0x4   :  { %v229_v7 = vld [vmem:[%s409_s3] sm:$0xff]   ;;  %v222_v9 = vunpack.c.l.bf16 %v221_v2  ;;  %v223_v10 = vunpack.c.h.bf16 %v221_v2  ;;  %v289_v26 = vld [vmem:[%s409_s3 + $0x8] sm:$0xff]   ;;  %v226_v37 = vunpack.c.l.bf16 %v288_v25  ;;  %v227_v38 = vunpack.c.h.bf16 %v288_v25 }
   0x5   :  { %v237_v8 = vld [vmem:[%s410_s4] sm:$0xff]   ;;  %v48_v12 = vmax.f32 %v206_v3, %v214_v5  ;;  %v49_v13 = vmax.f32 %v207_v4, %v215_v6  ;;  %v230_v14 = vunpack.c.l.bf16 %v229_v7  ;;  %v231_v15 = vunpack.c.h.bf16 %v229_v7  ;;  %v290_v36 = vld [vmem:[%s410_s4 + $0x8] sm:$0xff]  }
   0x6   :  { %v245_v11 = vld [vmem:[%s411_s5] sm:$0xff]   ;;  %v238_v18 = vunpack.c.l.bf16 %v237_v8  ;;  %v239_v19 = vunpack.c.h.bf16 %v237_v8  ;;  %v234_v39 = vunpack.c.l.bf16 %v289_v26  ;;  %v235_v40 = vunpack.c.h.bf16 %v289_v26  ;;  %v291_v46 = vld [vmem:[%s411_s5 + $0x8] sm:$0xff]  }
   0x7   :  { %v253_v16 = vld [vmem:[%s412_s6] sm:$0xff]   ;;  %v68_v21 = vmax.f32 %v48_v12, %v222_v9  ;;  %v69_v22 = vmax.f32 %v49_v13, %v223_v10  ;;  %v246_v23 = vunpack.c.l.bf16 %v245_v11  ;;  %v247_v24 = vunpack.c.h.bf16 %v245_v11  ;;  %v292_v55 = vld [vmem:[%s412_s6 + $0x8] sm:$0xff]  }
   0x8   :  { %v254_v27 = vunpack.c.l.bf16 %v253_v16  ;;  %v255_v28 = vunpack.c.h.bf16 %v253_v16  ;;  %v261_v33 = vld [vmem:[%s413_s7] sm:$0xff]   ;;  %v50_v44 = vmax.f32 %v210_v29, %v218_v34  ;;  %v51_v45 = vmax.f32 %v211_v30, %v219_v35  ;;  %v293_v0 = vld [vmem:[%s413_s7 + $0x8] sm:$0xff]  }
   0x9   :  { %v88_v31 = vmax.f32 %v68_v21, %v230_v14  ;;  %v89_v32 = vmax.f32 %v69_v22, %v231_v15  ;;  %v269_v43 = vld [vmem:[%s414_s8] sm:$0xff]   ;;  %v262_v47 = vunpack.c.l.bf16 %v261_v33  ;;  %v263_v48 = vunpack.c.h.bf16 %v261_v33  ;;  %v294_v7 = vld [vmem:[%s414_s8 + $0x8] sm:$0xff]  }
   0xa   :  { %v242_v49 = vunpack.c.l.bf16 %v290_v36  ;;  %v243_v50 = vunpack.c.h.bf16 %v290_v36  ;;  %v70_v53 = vmax.f32 %v50_v44, %v226_v37  ;;  %v71_v54 = vmax.f32 %v51_v45, %v227_v38 }
   0xb   :  { %v108_v41 = vmax.f32 %v88_v31, %v238_v18  ;;  %v109_v42 = vmax.f32 %v89_v32, %v239_v19  ;;  %v270_v56 = vunpack.c.l.bf16 %v269_v43  ;;  %v271_v57 = vunpack.c.h.bf16 %v269_v43 }
   0xc   :  { %v250_v58 = vunpack.c.l.bf16 %v291_v46  ;;  %v251_v59 = vunpack.c.h.bf16 %v291_v46  ;;  %v90_v62 = vmax.f32 %v70_v53, %v234_v39  ;;  %v91_v63 = vmax.f32 %v71_v54, %v235_v40 }
   0xd   :  { %v128_v51 = vmax.f32 %v108_v41, %v246_v23  ;;  %v129_v52 = vmax.f32 %v109_v42, %v247_v24  ;;  %v258_v1 = vunpack.c.l.bf16 %v292_v55  ;;  %v259_v2 = vunpack.c.h.bf16 %v292_v55 }
   0xe   :  { %v110_v5 = vmax.f32 %v90_v62, %v242_v49  ;;  %v111_v6 = vmax.f32 %v91_v63, %v243_v50  ;;  %v266_v8 = vunpack.c.l.bf16 %v293_v0  ;;  %v267_v9 = vunpack.c.h.bf16 %v293_v0 }
   0xf   :  { %v148_v60 = vmax.f32 %v128_v51, %v254_v27  ;;  %v149_v61 = vmax.f32 %v129_v52, %v255_v28  ;;  %v274_v14 = vunpack.c.l.bf16 %v294_v7  ;;  %v275_v18 = vunpack.c.h.bf16 %v294_v7 }
  0x10   :  { %v130_v12 = vmax.f32 %v110_v5, %v250_v58  ;;  %v131_v13 = vmax.f32 %v111_v6, %v251_v59 }
  0x11   :  { %v168_v3 = vmax.f32 %v148_v60, %v262_v47  ;;  %v169_v4 = vmax.f32 %v149_v61, %v263_v48 }
  0x12   :  { %v150_v16 = vmax.f32 %v130_v12, %v258_v1  ;;  %v151_v17 = vmax.f32 %v131_v13, %v259_v2 }
  0x13   :  { %v188_v10 = vmax.f32 %v168_v3, %v270_v56  ;;  %v189_v11 = vmax.f32 %v169_v4, %v271_v57 }
  0x14   :  { %v170_v19 = vmax.f32 %v150_v16, %v266_v8  ;;  %v171_v20 = vmax.f32 %v151_v17, %v267_v9 }
  0x15   :  { %v279_v15 = vpack.c.bf16 %v189_v11, %v188_v10 }
  0x16   :  { %v190_v21 = vmax.f32 %v170_v19, %v274_v14  ;;  %v191_v22 = vmax.f32 %v171_v20, %v275_v18 }
  0x17   :  { %280 = vst [vmem:[%s415_s9] sm:$0xff] %v279_v15  }
  0x18   :  { %v284_v23 = vpack.c.bf16 %v191_v22, %v190_v21 }
  0x1a   :  { %295 = vst [vmem:[%s415_s9 + $0x8] sm:$0xff] %v284_v23  }

// kernel: _lambda_.12
= control target key start
LH: loop header
LB: loop body
LE: loop exit
PB: predicated region body
PF: predicated region fallthrough
CT: control target
= control target key end

     0   :  { %vm243_vm0 = vcmask 1043456   ;;  %vm218_vm1 = vcmask 195584   ;;  %s905_s1 = inlined_call_operand.vmem [shape: bf16[152,128], index: 1, kind: input, shape index: {}]   ;;  %s906_s0 = inlined_call_operand.vmem [shape: bf16[128,152], index: 0, kind: input, shape index: {}]   ;;  %s907_s2 = inlined_call_operand.vmem [shape: f32[1,128], index: 2, kind: input, shape index: {}]   ;;  %s908_s3 = inlined_call_operand.vmem [shape: f32[1,128], index: 3, kind: input, shape index: {}]   ;;  %s909_s4 = inlined_call_operand.vmem [shape: bf16[128,128], index: 4, kind: output, shape index: {}]  }
   0x1   :  { %v619_v0 = vld [vmem:[%s905_s1 + $0x38] sm:$0xff]  ;;  %v88_v1 = vld [vmem:[%s905_s1 + $0x48] sm:$0xf]  ;;  %v618_v3 = vld [vmem:[%s905_s1 + $0x30] sm:$0xff] }
   0x2   :  { %v198_v2 = vunpack.c.l.b16 %v88_v1  ;;  %247 = vmatpush.bf16.msra.mxu0 %v619_v0  ;;  %668 = vmatpush.bf16.msra.mxu2 %v619_v0  ;;  %v620_v6 = vld [vmem:[%s905_s1 + $0x40] sm:$0xff]  ;;  %v617_v7 = vld [vmem:[%s905_s1 + $0x28] sm:$0xff]  ;;  %v606_v10 = vld [vmem:[%s906_s0 + $0x54] sm:$0xf] }
   0x3   :  { %v596_v8 = vld [vmem:[%s906_s0 + $0x4] sm:$0xf]  ;;  %v492_v9 = vld [vmem:[%s906_s0 + $0x8] sm:$0xf0]  ;;  %v532_v11 = vld [vmem:[%s906_s0 + $0x58] sm:$0xf0] }
   0x4   :  { %v208_v4 = vpack.c.b16 %v198_v2, %v198_v2  ;;  %v495_v12 = vor.u32 %v596_v8, %v492_v9  ;;  %v616_v13 = vld [vmem:[%s905_s1 + $0x20] sm:$0xff]  ;;  %v535_v14 = vor.u32 %v606_v10, %v532_v11  ;;  %v615_v15 = vld [vmem:[%s905_s1 + $0x18] sm:$0xff]  ;;  %v614_v16 = vld [vmem:[%s905_s1 + $0x10] sm:$0xff] }
   0x5   :  { %v613_v17 = vld [vmem:[%s905_s1 + $0x8] sm:$0xff]  ;;  %v598_v18 = vld [vmem:[%s906_s0 + $0x14] sm:$0xf]  ;;  %v500_v19 = vld [vmem:[%s906_s0 + $0x18] sm:$0xf0] }
   0x6   :  { %v245_v5 = vsel %vm243_vm0, %v208_v4, 0  ;;  %248 = vmatpush.bf16.msra.mxu0 %v618_v3  ;;  %669 = vmatpush.bf16.msra.mxu2 %v618_v3  ;;  %v608_v20 = vld [vmem:[%s906_s0 + $0x64] sm:$0xf]  ;;  %v540_v21 = vld [vmem:[%s906_s0 + $0x68] sm:$0xf0]  ;;  %v503_v22 = vor.u32 %v598_v18, %v500_v19 }
   0x7   :  { %302 = vmatpush.bf16.msra.mxu1 %v245_v5  ;;  %676 = vmatpush.bf16.msra.mxu3 %v245_v5  ;;  %v612_v23 = vld [vmem:[%s905_s1] sm:$0xff]  ;;  %v597_v25 = vld [vmem:[%s906_s0 + $0x4] sm:$0xf0]  ;;  %v543_v27 = vor.u32 %v608_v20, %v540_v21  ;;  %v508_v32 = vld [vmem:[%s906_s0 + $0x28] sm:$0xf0] }
   0x8   :  { %v490_v24 = vld [vmem:[%s906_s0] sm:$0xf]  ;;  %v605_v28 = vld [vmem:[%s906_s0 + $0x44] sm:$0xf0]  ;;  %v600_v31 = vld [vmem:[%s906_s0 + $0x24] sm:$0xf] }
   0x9   :  { %v522_v26 = vld [vmem:[%s906_s0 + $0x40] sm:$0xf]  ;;  %v491_v29 = vor.u32 %v597_v25, %v490_v24  ;;  %v610_v33 = vld [vmem:[%s906_s0 + $0x74] sm:$0xf]  ;;  %v548_v34 = vld [vmem:[%s906_s0 + $0x78] sm:$0xf0]  ;;  %v511_v35 = vor.u32 %v600_v31, %v508_v32 }
   0xa   :  { %249 = vmatpush.bf16.msra.mxu0 %v617_v7  ;;  %670 = vmatpush.bf16.msra.mxu2 %v617_v7  ;;  %v523_v30 = vor.u32 %v605_v28, %v522_v26  ;;  %v498_v36 = vld [vmem:[%s906_s0 + $0x10] sm:$0xf]  ;;  %v599_v37 = vld [vmem:[%s906_s0 + $0x14] sm:$0xf0]  ;;  %v551_v38 = vor.u32 %v610_v33, %v548_v34  ;;  %v602_v43 = vld [vmem:[%s906_s0 + $0x34] sm:$0xf] }
   0xb   :  { %303 = vmatpush.bf16.msra.mxu1 %v620_v6  ;;  %677 = vmatpush.bf16.msra.mxu3 %v620_v6  ;;  %v530_v39 = vld [vmem:[%s906_s0 + $0x50] sm:$0xf]  ;;  %v607_v40 = vld [vmem:[%s906_s0 + $0x54] sm:$0xf0]  ;;  %v499_v41 = vor.u32 %v599_v37, %v498_v36  ;;  %v516_v44 = vld [vmem:[%s906_s0 + $0x38] sm:$0xf0] }
   0xc   :  { %v531_v42 = vor.u32 %v607_v40, %v530_v39  ;;  %v519_v45 = vor.u32 %v602_v43, %v516_v44  ;;  %v506_v46 = vld [vmem:[%s906_s0 + $0x20] sm:$0xf]  ;;  %v601_v47 = vld [vmem:[%s906_s0 + $0x24] sm:$0xf0]  ;;  %v604_v52 = vld [vmem:[%s906_s0 + $0x44] sm:$0xf] }
   0xd   :  { %v538_v48 = vld [vmem:[%s906_s0 + $0x60] sm:$0xf]  ;;  %v609_v49 = vld [vmem:[%s906_s0 + $0x64] sm:$0xf0]  ;;  %v507_v50 = vor.u32 %v601_v47, %v506_v46  ;;  %v524_v53 = vld [vmem:[%s906_s0 + $0x48] sm:$0xf0] }
   0xe   :  { %588 = vmatmul.msk.bf16.vlgmr.msra.gmra.mxu1 %vm218_vm1, %v495_v12  ;;  %250 = vmatpush.bf16.msra.mxu0 %v616_v13  ;;  %v539_v51 = vor.u32 %v609_v49, %v538_v48  ;;  %v527_v54 = vor.u32 %v604_v52, %v524_v53  ;;  %v514_v55 = vld [vmem:[%s906_s0 + $0x30] sm:$0xf]  ;;  %v603_v56 = vld [vmem:[%s906_s0 + $0x34] sm:$0xf0]  ;;  %v842_v2 = vld [vmem:[%s907_s2] ss:$0 sm:$0xff] }
   0xf   :  { %593 = vmatmul.msk.bf16.vlgmr.msra.gmra.mxu3 %vm218_vm1, %v535_v14  ;;  %671 = vmatpush.bf16.msra.mxu2 %v616_v13  ;;  %v546_v57 = vld [vmem:[%s906_s0 + $0x70] sm:$0xf]  ;;  %v611_v58 = vld [vmem:[%s906_s0 + $0x74] sm:$0xf0]  ;;  %v515_v59 = vor.u32 %v603_v56, %v514_v55  ;;  %v848_v5 = vld [vmem:[%s908_s3] ss:$0 sm:$0xff] }
  0x10   :  { %v547_v60 = vor.u32 %v611_v58, %v546_v57 }
  0x12   :  { %251 = vmatpush.bf16.msra.mxu0 %v615_v15 }
  0x13   :  { %672 = vmatpush.bf16.msra.mxu2 %v615_v15 }
  0x16   :  { %252 = vmatpush.bf16.msra.mxu0 %v614_v16 }
  0x17   :  { %673 = vmatpush.bf16.msra.mxu2 %v614_v16 }
  0x1a   :  { %253 = vmatpush.bf16.msra.mxu0 %v613_v17 }
  0x1b   :  { %674 = vmatpush.bf16.msra.mxu2 %v613_v17 }
  0x1e   :  { %589 = vmatmul.msk.bf16.gmra.mxu1 %vm218_vm1, %v503_v22  ;;  %254 = vmatpush.bf16.msra.mxu0 %v612_v23 }
  0x1f   :  { %594 = vmatmul.msk.bf16.gmra.mxu3 %vm218_vm1, %v543_v27  ;;  %675 = vmatpush.bf16.msra.mxu2 %v612_v23 }
  0x21   :  { %255 = vmatmul.bf16.vlgmr.msra.gmra.mxu0 %v491_v29 }
  0x22   :  { %275 = vmatmul.bf16.vlgmr.msra.gmra.mxu2 %v523_v30 }
  0x2e   :  { %590 = vmatmul.msk.bf16.gmra.mxu1 %vm218_vm1, %v511_v35 }
  0x2f   :  { %595 = vmatmul.msk.bf16.gmra.mxu3 %vm218_vm1, %v551_v38 }
  0x31   :  { %260 = vmatmul.bf16.gmra.mxu0 %v499_v41 }
  0x32   :  { %280 = vmatmul.bf16.gmra.mxu2 %v531_v42 }
  0x3e   :  { %591 = vmatmul.msk.bf16.gmra.mxu1 %vm218_vm1, %v519_v45 }
  0x41   :  { %265 = vmatmul.bf16.gmra.mxu0 %v507_v50 }
  0x42   :  { %285 = vmatmul.bf16.gmra.mxu2 %v539_v51 }
  0x4e   :  { %592 = vmatmul.msk.bf16.gmra.mxu1 %vm218_vm1, %v527_v54 }
  0x51   :  { %270 = vmatmul.bf16.gmra.mxu0 %v515_v59 }
  0x52   :  { %290 = vmatmul.bf16.gmra.mxu2 %v547_v60 }
  0x8b   :  { %v305_v61 = vpop.f32.mrf.mxu1 }
  0x92   :  { %v330_v13 = vpop.f32.mrf.mxu3 }
  0x93   :  { %v307_v62 = vpop.f32.mrf.mxu1 }
  0x9a   :  { %v332_v23 = vpop.f32.mrf.mxu3 }
  0x9b   :  { %v310_v63 = vpop.f32.mrf.mxu1 }
  0x9e   :  { %v256_v0 = vpop.f32.mrf.mxu0 }
  0x9f   :  { %v306_v1 = vadd.f32 %v305_v61, %v256_v0 }
  0xa1   :  { %v400_v4 = vmul.f32 %v842_v2, %v306_v1 }
  0xa2   :  { %v335_v38 = vpop.f32.mrf.mxu3 }
  0xa3   :  { %v312_v3 = vpop.f32.mrf.mxu1  ;;  %v420_v9 = vadd.f32 %v848_v5, %v400_v4 }
  0xa5   :  { %v276_v6 = vpop.f32.mrf.mxu2  ;;  %v436_v14 = vmax.f32 %v420_v9, 0.0 }
  0xa6   :  { %v258_v7 = vpop.f32.mrf.mxu0 }
  0xa7   :  { %v308_v8 = vadd.f32 %v307_v62, %v258_v7 }
  0xa9   :  { %v401_v10 = vmul.f32 %v842_v2, %v308_v8 }
  0xaa   :  { %v337_v53 = vpop.f32.mrf.mxu3 }
  0xab   :  { %v315_v11 = vpop.f32.mrf.mxu1  ;;  %v421_v12 = vadd.f32 %v848_v5, %v401_v10 }
  0xad   :  { %v437_v15 = vmax.f32 %v421_v12, 0.0  ;;  %v278_v16 = vpop.f32.mrf.mxu2 }
  0xae   :  { %v261_v17 = vpop.f32.mrf.mxu0 }
  0xaf   :  { %v624_v18 = vpack.c.bf16 %v437_v15, %v436_v14  ;;  %v311_v19 = vadd.f32 %v310_v63, %v261_v17 }
  0xb1   :  { %625 = vst [vmem:[%s909_s4] sm:$0xff] %v624_v18   ;;  %v402_v21 = vmul.f32 %v842_v2, %v311_v19 }
  0xb2   :  { %v340_v10 = vpop.f32.mrf.mxu3 }
  0xb3   :  { %v317_v20 = vpop.f32.mrf.mxu1  ;;  %v422_v27 = vadd.f32 %v848_v5, %v402_v21 }
  0xb5   :  { %v281_v22 = vpop.f32.mrf.mxu2  ;;  %v438_v32 = vmax.f32 %v422_v27, 0.0 }
  0xb6   :  { %v263_v24 = vpop.f32.mrf.mxu0  ;;  %v331_v26 = vadd.f32 %v330_v13, %v281_v22 }
  0xb7   :  { %v313_v25 = vadd.f32 %v312_v3, %v263_v24 }
  0xb8   :  { %v410_v31 = vmul.f32 %v842_v2, %v331_v26 }
  0xb9   :  { %v403_v28 = vmul.f32 %v842_v2, %v313_v25 }
  0xba   :  { %v430_v39 = vadd.f32 %v848_v5, %v410_v31 }
  0xbb   :  { %v320_v29 = vpop.f32.mrf.mxu1  ;;  %v423_v30 = vadd.f32 %v848_v5, %v403_v28 }
  0xbc   :  { %v446_v44 = vmax.f32 %v430_v39, 0.0 }
  0xbd   :  { %v439_v33 = vmax.f32 %v423_v30, 0.0  ;;  %v283_v34 = vpop.f32.mrf.mxu2  ;;  %v342_v30 = vpop.f32.mrf.mxu3 }
  0xbe   :  { %v333_v35 = vadd.f32 %v332_v23, %v283_v34  ;;  %v266_v36 = vpop.f32.mrf.mxu0 }
  0xbf   :  { %v629_v37 = vpack.c.bf16 %v439_v33, %v438_v32  ;;  %v316_v41 = vadd.f32 %v315_v11, %v266_v36 }
  0xc0   :  { %v411_v40 = vmul.f32 %v842_v2, %v333_v35 }
  0xc1   :  { %661 = vst [vmem:[%s909_s4 + $0x8] sm:$0xff] %v629_v37   ;;  %v404_v46 = vmul.f32 %v842_v2, %v316_v41 }
  0xc2   :  { %v431_v42 = vadd.f32 %v848_v5, %v411_v40 }
  0xc3   :  { %v322_v43 = vpop.f32.mrf.mxu1  ;;  %v424_v52 = vadd.f32 %v848_v5, %v404_v46 }
  0xc4   :  { %v447_v45 = vmax.f32 %v431_v42, 0.0 }
  0xc5   :  { %v286_v47 = vpop.f32.mrf.mxu2  ;;  %v440_v58 = vmax.f32 %v424_v52, 0.0 }
  0xc6   :  { %v649_v48 = vpack.c.bf16 %v447_v45, %v446_v44  ;;  %v268_v49 = vpop.f32.mrf.mxu0  ;;  %v336_v51 = vadd.f32 %v335_v38, %v286_v47 }
  0xc7   :  { %v318_v50 = vadd.f32 %v317_v20, %v268_v49 }
  0xc8   :  { %665 = vst [vmem:[%s909_s4 + $0x28] sm:$0xff] %v649_v48   ;;  %v412_v57 = vmul.f32 %v842_v2, %v336_v51 }
  0xc9   :  { %v405_v54 = vmul.f32 %v842_v2, %v318_v50 }
  0xca   :  { %v432_v1 = vadd.f32 %v848_v5, %v412_v57 }
  0xcb   :  { %v325_v55 = vpop.f32.mrf.mxu1  ;;  %v425_v56 = vadd.f32 %v848_v5, %v405_v54 }
  0xcc   :  { %v326_v60 = vadd.f32 %v325_v55, %v276_v6  ;;  %v448_v11 = vmax.f32 %v432_v1, 0.0 }
  0xcd   :  { %v441_v59 = vmax.f32 %v425_v56, 0.0  ;;  %v288_v61 = vpop.f32.mrf.mxu2 }
  0xce   :  { %v338_v62 = vadd.f32 %v337_v53, %v288_v61  ;;  %v271_v63 = vpop.f32.mrf.mxu0  ;;  %v408_v4 = vmul.f32 %v842_v2, %v326_v60 }
  0xcf   :  { %v634_v0 = vpack.c.bf16 %v441_v59, %v440_v58  ;;  %v321_v7 = vadd.f32 %v320_v29, %v271_v63 }
  0xd0   :  { %v413_v3 = vmul.f32 %v842_v2, %v338_v62  ;;  %v428_v13 = vadd.f32 %v848_v5, %v408_v4 }
  0xd1   :  { %662 = vst [vmem:[%s909_s4 + $0x10] sm:$0xff] %v634_v0   ;;  %v406_v14 = vmul.f32 %v842_v2, %v321_v7 }
  0xd2   :  { %v433_v8 = vadd.f32 %v848_v5, %v413_v3 }
  0xd3   :  { %v327_v9 = vpop.f32.mrf.mxu1  ;;  %v426_v23 = vadd.f32 %v848_v5, %v406_v14 }
  0xd4   :  { %v328_v6 = vadd.f32 %v327_v9, %v278_v16  ;;  %v449_v12 = vmax.f32 %v433_v8, 0.0  ;;  %v444_v16 = vmax.f32 %v428_v13, 0.0 }
  0xd5   :  { %v291_v17 = vpop.f32.mrf.mxu2  ;;  %v442_v29 = vmax.f32 %v426_v23, 0.0 }
  0xd6   :  { %v409_v15 = vmul.f32 %v842_v2, %v328_v6  ;;  %v654_v18 = vpack.c.bf16 %v449_v12, %v448_v11  ;;  %v273_v19 = vpop.f32.mrf.mxu0  ;;  %v341_v22 = vadd.f32 %v340_v10, %v291_v17 }
  0xd7   :  { %v323_v21 = vadd.f32 %v322_v43, %v273_v19 }
  0xd8   :  { %v429_v20 = vadd.f32 %v848_v5, %v409_v15  ;;  %666 = vst [vmem:[%s909_s4 + $0x30] sm:$0xff] %v654_v18   ;;  %v414_v28 = vmul.f32 %v842_v2, %v341_v22 }
  0xd9   :  { %v407_v25 = vmul.f32 %v842_v2, %v323_v21 }
  0xda   :  { %v445_v24 = vmax.f32 %v429_v20, 0.0  ;;  %v434_v35 = vadd.f32 %v848_v5, %v414_v28 }
  0xdb   :  { %v427_v27 = vadd.f32 %v848_v5, %v407_v25 }
  0xdc   :  { %v644_v26 = vpack.c.bf16 %v445_v24, %v444_v16  ;;  %v450_v38 = vmax.f32 %v434_v35, 0.0 }
  0xdd   :  { %v443_v31 = vmax.f32 %v427_v27, 0.0  ;;  %v293_v32 = vpop.f32.mrf.mxu2 }
  0xde   :  { %664 = vst [vmem:[%s909_s4 + $0x20] sm:$0xff] %v644_v26   ;;  %v343_v33 = vadd.f32 %v342_v30, %v293_v32 }
  0xdf   :  { %v639_v34 = vpack.c.bf16 %v443_v31, %v442_v29 }
  0xe0   :  { %v415_v36 = vmul.f32 %v842_v2, %v343_v33 }
  0xe1   :  { %663 = vst [vmem:[%s909_s4 + $0x18] sm:$0xff] %v639_v34  }
  0xe2   :  { %v435_v37 = vadd.f32 %v848_v5, %v415_v36 }
  0xe4   :  { %v451_v39 = vmax.f32 %v435_v37, 0.0 }
  0xe6   :  { %v659_v40 = vpack.c.bf16 %v451_v39, %v450_v38 }
  0xe8   :  { %667 = vst [vmem:[%s909_s4 + $0x38] sm:$0xff] %v659_v40  }

// kernel: _lambda_.14
= control target key start
LH: loop header
LB: loop body
LE: loop exit
PB: predicated region body
PF: predicated region fallthrough
CT: control target
= control target key end

     0   :  { %s313_s1 = inlined_call_operand.vmem [shape: bf16[128,128], index: 1, kind: input, shape index: {}]   ;;  %s314_s2 = inlined_call_operand.vmem [shape: f32[1,128], index: 2, kind: input, shape index: {}]   ;;  %s315_s3 = inlined_call_operand.vmem [shape: f32[1,128], index: 3, kind: input, shape index: {}]   ;;  %s316_s0 = inlined_call_operand.vmem [shape: bf16[32,128], index: 0, kind: input, shape index: {}]   ;;  %s317_s4 = inlined_call_operand.vmem [shape: bf16[32,128], index: 4, kind: output, shape index: {}]  }
   0x1   :  { %v224_v0 = vld [vmem:[%s313_s1 + $0x38] sm:$0xff]  ;;  %v223_v1 = vld [vmem:[%s313_s1 + $0x30] sm:$0xff]  ;;  %v222_v2 = vld [vmem:[%s313_s1 + $0x28] sm:$0xff] }
   0x2   :  { %109 = vmatpush.bf16.msra.mxu0 %v224_v0  ;;  %236 = vmatpush.bf16.msra.mxu1 %v224_v0  ;;  %v221_v3 = vld [vmem:[%s313_s1 + $0x20] sm:$0xff]  ;;  %v220_v4 = vld [vmem:[%s313_s1 + $0x18] sm:$0xff]  ;;  %v219_v5 = vld [vmem:[%s313_s1 + $0x10] sm:$0xff] }
   0x3   :  { %v218_v6 = vld [vmem:[%s313_s1 + $0x8] sm:$0xff]  ;;  %v217_v7 = vld [vmem:[%s313_s1] sm:$0xff] }
   0x4   :  { %v215_v8 = vld [vmem:[%s316_s0] sm:$0xff]  ;;  %v216_v9 = vld [vmem:[%s316_s0 + $0x8] sm:$0xff] }
   0x5   :  { %v244_v12 = vld [vmem:[%s314_s2] ss:$0 sm:$0xff] }
   0x6   :  { %110 = vmatpush.bf16.msra.mxu0 %v223_v1  ;;  %237 = vmatpush.bf16.msra.mxu1 %v223_v1  ;;  %v245_v14 = vld [vmem:[%s315_s3] ss:$0 sm:$0xff] }
   0xa   :  { %111 = vmatpush.bf16.msra.mxu0 %v222_v2  ;;  %238 = vmatpush.bf16.msra.mxu1 %v222_v2 }
   0xe   :  { %112 = vmatpush.bf16.msra.mxu0 %v221_v3  ;;  %239 = vmatpush.bf16.msra.mxu1 %v221_v3 }
  0x12   :  { %113 = vmatpush.bf16.msra.mxu0 %v220_v4  ;;  %240 = vmatpush.bf16.msra.mxu1 %v220_v4 }
  0x16   :  { %114 = vmatpush.bf16.msra.mxu0 %v219_v5  ;;  %241 = vmatpush.bf16.msra.mxu1 %v219_v5 }
  0x1a   :  { %115 = vmatpush.bf16.msra.mxu0 %v218_v6  ;;  %242 = vmatpush.bf16.msra.mxu1 %v218_v6 }
  0x1e   :  { %116 = vmatpush.bf16.msra.mxu0 %v217_v7  ;;  %243 = vmatpush.bf16.msra.mxu1 %v217_v7 }
  0x21   :  { %117 = vmatmul.bf16.vlgmr.msra.gmra.mxu0 %v215_v8  ;;  %122 = vmatmul.bf16.vlgmr.msra.gmra.mxu1 %v216_v9 }
  0x9e   :  { %v118_v10 = vpop.f32.mrf.mxu0  ;;  %v123_v11 = vpop.f32.mrf.mxu1 }
  0x9f   :  { %v147_v13 = vmul.f32 %v244_v12, %v118_v10  ;;  %v149_v15 = vmul.f32 %v244_v12, %v123_v11 }
  0xa1   :  { %v155_v18 = vadd.f32 %v245_v14, %v147_v13  ;;  %v157_v19 = vadd.f32 %v245_v14, %v149_v15 }
  0xa3   :  { %v159_v24 = vmax.f32 %v155_v18, 0.0  ;;  %v161_v25 = vmax.f32 %v157_v19, 0.0 }
  0xa6   :  { %v120_v16 = vpop.f32.mrf.mxu0  ;;  %v125_v17 = vpop.f32.mrf.mxu1 }
  0xa7   :  { %v148_v20 = vmul.f32 %v244_v12, %v120_v16  ;;  %v150_v21 = vmul.f32 %v244_v12, %v125_v17 }
  0xa9   :  { %v156_v22 = vadd.f32 %v245_v14, %v148_v20  ;;  %v158_v23 = vadd.f32 %v245_v14, %v150_v21 }
  0xab   :  { %v160_v26 = vmax.f32 %v156_v22, 0.0  ;;  %v162_v27 = vmax.f32 %v158_v23, 0.0 }
  0xad   :  { %v228_v28 = vpack.c.bf16 %v160_v26, %v159_v24  ;;  %v233_v29 = vpack.c.bf16 %v162_v27, %v161_v25 }
  0xaf   :  { %229 = vst [vmem:[%s317_s4] sm:$0xff] %v228_v28  }
  0xb0   :  { %235 = vst [vmem:[%s317_s4 + $0x8] sm:$0xff] %v233_v29  }

// kernel: _lambda_.16
= control target key start
LH: loop header
LB: loop body
LE: loop exit
PB: predicated region body
PF: predicated region fallthrough
CT: control target
= control target key end

     0   :  { %s505_s1 = inlined_call_operand.vmem [shape: bf16[128,256], index: 1, kind: input, shape index: {}]   ;;  %s506_s0 = inlined_call_operand.vmem [shape: bf16[32,128], index: 0, kind: input, shape index: {}]   ;;  %s507_s2 = inlined_call_operand.vmem [shape: f32[1,256], index: 2, kind: input, shape index: {}]   ;;  %s508_s3 = inlined_call_operand.vmem [shape: f32[1,256], index: 3, kind: input, shape index: {}]   ;;  %s509_s4 = inlined_call_operand.vmem [shape: bf16[32,256], index: 4, kind: output, shape index: {}]  }
   0x1   :  { %v320_v0 = vld [vmem:[%s505_s1 + $0x70] sm:$0xf]  ;;  %v343_v1 = vld [vmem:[%s505_s1 + $0x74] sm:$0xf0]  ;;  %v342_v2 = vld [vmem:[%s505_s1 + $0x74] sm:$0xf] }
   0x2   :  { %v321_v3 = vor.u32 %v343_v1, %v320_v0  ;;  %v322_v4 = vld [vmem:[%s505_s1 + $0x78] sm:$0xf0]  ;;  %v312_v5 = vld [vmem:[%s505_s1 + $0x60] sm:$0xf]  ;;  %v341_v6 = vld [vmem:[%s505_s1 + $0x64] sm:$0xf0] }
   0x3   :  { %v325_v7 = vor.u32 %v342_v2, %v322_v4  ;;  %v340_v8 = vld [vmem:[%s505_s1 + $0x64] sm:$0xf]  ;;  %v314_v9 = vld [vmem:[%s505_s1 + $0x68] sm:$0xf0]  ;;  %v313_v10 = vor.u32 %v341_v6, %v312_v5  ;;  %v304_v12 = vld [vmem:[%s505_s1 + $0x50] sm:$0xf] }
   0x4   :  { %149 = vmatpush.bf16.msra.mxu0 %v321_v3  ;;  %344 = vmatpush.bf16.msra.mxu2 %v321_v3  ;;  %v317_v11 = vor.u32 %v340_v8, %v314_v9  ;;  %v339_v13 = vld [vmem:[%s505_s1 + $0x54] sm:$0xf0]  ;;  %v338_v14 = vld [vmem:[%s505_s1 + $0x54] sm:$0xf]  ;;  %v306_v15 = vld [vmem:[%s505_s1 + $0x58] sm:$0xf0] }
   0x5   :  { %168 = vmatpush.bf16.msra.mxu1 %v325_v7  ;;  %352 = vmatpush.bf16.msra.mxu3 %v325_v7  ;;  %v305_v16 = vor.u32 %v339_v13, %v304_v12  ;;  %v309_v17 = vor.u32 %v338_v14, %v306_v15  ;;  %v296_v18 = vld [vmem:[%s505_s1 + $0x40] sm:$0xf]  ;;  %v337_v19 = vld [vmem:[%s505_s1 + $0x44] sm:$0xf0]  ;;  %v336_v20 = vld [vmem:[%s505_s1 + $0x44] sm:$0xf] }
   0x6   :  { %v298_v21 = vld [vmem:[%s505_s1 + $0x48] sm:$0xf0]  ;;  %v297_v22 = vor.u32 %v337_v19, %v296_v18  ;;  %v288_v24 = vld [vmem:[%s505_s1 + $0x30] sm:$0xf]  ;;  %v335_v25 = vld [vmem:[%s505_s1 + $0x34] sm:$0xf0] }
   0x7   :  { %v301_v23 = vor.u32 %v336_v20, %v298_v21  ;;  %v334_v26 = vld [vmem:[%s505_s1 + $0x34] sm:$0xf]  ;;  %v290_v27 = vld [vmem:[%s505_s1 + $0x38] sm:$0xf0]  ;;  %v289_v28 = vor.u32 %v335_v25, %v288_v24  ;;  %v280_v30 = vld [vmem:[%s505_s1 + $0x20] sm:$0xf] }
   0x8   :  { %150 = vmatpush.bf16.msra.mxu0 %v313_v10  ;;  %345 = vmatpush.bf16.msra.mxu2 %v313_v10  ;;  %v293_v29 = vor.u32 %v334_v26, %v290_v27  ;;  %v333_v31 = vld [vmem:[%s505_s1 + $0x24] sm:$0xf0]  ;;  %v332_v32 = vld [vmem:[%s505_s1 + $0x24] sm:$0xf]  ;;  %v282_v33 = vld [vmem:[%s505_s1 + $0x28] sm:$0xf0] }
   0x9   :  { %169 = vmatpush.bf16.msra.mxu1 %v317_v11  ;;  %353 = vmatpush.bf16.msra.mxu3 %v317_v11  ;;  %v281_v34 = vor.u32 %v333_v31, %v280_v30  ;;  %v285_v35 = vor.u32 %v332_v32, %v282_v33  ;;  %v272_v36 = vld [vmem:[%s505_s1 + $0x10] sm:$0xf]  ;;  %v331_v37 = vld [vmem:[%s505_s1 + $0x14] sm:$0xf0]  ;;  %v330_v38 = vld [vmem:[%s505_s1 + $0x14] sm:$0xf] }
   0xa   :  { %v274_v39 = vld [vmem:[%s505_s1 + $0x18] sm:$0xf0]  ;;  %v273_v40 = vor.u32 %v331_v37, %v272_v36  ;;  %v264_v42 = vld [vmem:[%s505_s1] sm:$0xf]  ;;  %v329_v43 = vld [vmem:[%s505_s1 + $0x4] sm:$0xf0] }
   0xb   :  { %v277_v41 = vor.u32 %v330_v38, %v274_v39  ;;  %v328_v44 = vld [vmem:[%s505_s1 + $0x4] sm:$0xf]  ;;  %v266_v45 = vld [vmem:[%s505_s1 + $0x8] sm:$0xf0]  ;;  %v265_v46 = vor.u32 %v329_v43, %v264_v42  ;;  %v214_v50 = vld [vmem:[%s507_s2] sm:$0x3] }
   0xc   :  { %151 = vmatpush.bf16.msra.mxu0 %v305_v16  ;;  %346 = vmatpush.bf16.msra.mxu2 %v305_v16  ;;  %v269_v47 = vor.u32 %v328_v44, %v266_v45  ;;  %v326_v48 = vld [vmem:[%s506_s0] sm:$0xff]  ;;  %v327_v49 = vld [vmem:[%s506_s0 + $0x8] sm:$0xff]  ;;  %v216_v52 = vperm.slane %v214_v50, 0  ;;  %v217_v53 = vperm.slane %v214_v50, 1 }
   0xd   :  { %170 = vmatpush.bf16.msra.mxu1 %v309_v17  ;;  %354 = vmatpush.bf16.msra.mxu3 %v309_v17  ;;  %v228_v51 = vld [vmem:[%s508_s3] sm:$0x3] }
   0xe   :  { %v230_v54 = vperm.slane %v228_v51, 0  ;;  %v231_v56 = vperm.slane %v228_v51, 1 }
  0x10   :  { %152 = vmatpush.bf16.msra.mxu0 %v297_v22  ;;  %347 = vmatpush.bf16.msra.mxu2 %v297_v22 }
  0x11   :  { %171 = vmatpush.bf16.msra.mxu1 %v301_v23  ;;  %355 = vmatpush.bf16.msra.mxu3 %v301_v23 }
  0x14   :  { %153 = vmatpush.bf16.msra.mxu0 %v289_v28  ;;  %348 = vmatpush.bf16.msra.mxu2 %v289_v28 }
  0x15   :  { %172 = vmatpush.bf16.msra.mxu1 %v293_v29  ;;  %356 = vmatpush.bf16.msra.mxu3 %v293_v29 }
  0x18   :  { %154 = vmatpush.bf16.msra.mxu0 %v281_v34  ;;  %349 = vmatpush.bf16.msra.mxu2 %v281_v34 }
  0x19   :  { %173 = vmatpush.bf16.msra.mxu1 %v285_v35  ;;  %357 = vmatpush.bf16.msra.mxu3 %v285_v35 }
  0x1c   :  { %155 = vmatpush.bf16.msra.mxu0 %v273_v40  ;;  %350 = vmatpush.bf16.msra.mxu2 %v273_v40 }
  0x1d   :  { %174 = vmatpush.bf16.msra.mxu1 %v277_v41  ;;  %358 = vmatpush.bf16.msra.mxu3 %v277_v41 }
  0x20   :  { %156 = vmatpush.bf16.msra.mxu0 %v265_v46  ;;  %351 = vmatpush.bf16.msra.mxu2 %v265_v46 }
  0x21   :  { %175 = vmatpush.bf16.msra.mxu1 %v269_v47  ;;  %359 = vmatpush.bf16.msra.mxu3 %v269_v47 }
  0x23   :  { %157 = vmatmul.bf16.vlgmr.msra.gmra.mxu0 %v326_v48  ;;  %162 = vmatmul.bf16.vlgmr.msra.gmra.mxu2 %v327_v49 }
  0x24   :  { %176 = vmatmul.bf16.vlgmr.msra.gmra.mxu1 %v326_v48  ;;  %181 = vmatmul.bf16.vlgmr.msra.gmra.mxu3 %v327_v49 }
  0xa0   :  { %v158_v55 = vpop.f32.mrf.mxu0 }
  0xa1   :  { %v220_v57 = vmul.f32 %v216_v52, %v158_v55  ;;  %v177_v58 = vpop.f32.mrf.mxu1 }
  0xa2   :  { %v221_v59 = vmul.f32 %v217_v53, %v177_v58 }
  0xa3   :  { %v234_v60 = vadd.f32 %v230_v54, %v220_v57 }
  0xa4   :  { %v235_v61 = vadd.f32 %v231_v56, %v221_v59 }
  0xa6   :  { %v242_v62 = vpack.c.bf16 %v235_v61, %v234_v60  ;;  %v163_v63 = vpop.f32.mrf.mxu2 }
  0xa7   :  { %v224_v0 = vmul.f32 %v216_v52, %v163_v63  ;;  %v182_v1 = vpop.f32.mrf.mxu3 }
  0xa8   :  { %246 = vst [vmem:[%s509_s4] sm:$0xff] %v242_v62  ;;  %v225_v2 = vmul.f32 %v217_v53, %v182_v1  ;;  %v160_v3 = vpop.f32.mrf.mxu0 }
  0xa9   :  { %v238_v4 = vadd.f32 %v230_v54, %v224_v0  ;;  %v222_v5 = vmul.f32 %v216_v52, %v160_v3  ;;  %v179_v6 = vpop.f32.mrf.mxu1 }
  0xaa   :  { %v239_v7 = vadd.f32 %v231_v56, %v225_v2  ;;  %v223_v8 = vmul.f32 %v217_v53, %v179_v6 }
  0xab   :  { %v236_v9 = vadd.f32 %v230_v54, %v222_v5 }
  0xac   :  { %v244_v10 = vpack.c.bf16 %v239_v7, %v238_v4  ;;  %v237_v11 = vadd.f32 %v231_v56, %v223_v8 }
  0xae   :  { %248 = vst [vmem:[%s509_s4 + $0x10] sm:$0xff] %v244_v10  ;;  %v243_v12 = vpack.c.bf16 %v237_v11, %v236_v9  ;;  %v165_v13 = vpop.f32.mrf.mxu2 }
  0xaf   :  { %v226_v14 = vmul.f32 %v216_v52, %v165_v13  ;;  %v184_v15 = vpop.f32.mrf.mxu3 }
  0xb0   :  { %247 = vst [vmem:[%s509_s4 + $0x8] sm:$0xff] %v243_v12  ;;  %v227_v16 = vmul.f32 %v217_v53, %v184_v15 }
  0xb1   :  { %v240_v17 = vadd.f32 %v230_v54, %v226_v14 }
  0xb2   :  { %v241_v18 = vadd.f32 %v231_v56, %v227_v16 }
  0xb4   :  { %v245_v19 = vpack.c.bf16 %v241_v18, %v240_v17 }
  0xb6   :  { %249 = vst [vmem:[%s509_s4 + $0x18] sm:$0xff] %v245_v19 }

// kernel: _lambda_.17
= control target key start
LH: loop header
LB: loop body
LE: loop exit
PB: predicated region body
PF: predicated region fallthrough
CT: control target
= control target key end

     0   :  { %s553_s1 = inlined_call_operand.vmem [shape: bf16[128,256], index: 1, kind: input, shape index: {}]   ;;  %s554_s0 = inlined_call_operand.vmem [shape: bf16[32,128], index: 0, kind: input, shape index: {}]   ;;  %s555_s2 = inlined_call_operand.vmem [shape: f32[1,256], index: 2, kind: input, shape index: {}]   ;;  %s556_s3 = inlined_call_operand.vmem [shape: f32[1,256], index: 3, kind: input, shape index: {}]   ;;  %s557_s4 = inlined_call_operand.vmem [shape: bf16[32,256], index: 4, kind: input, shape index: {}]   ;;  %s558_s5 = inlined_call_operand.vmem [shape: bf16[32,256], index: 5, kind: output, shape index: {}]  }
   0x1   :  { %v351_v0 = vld [vmem:[%s553_s1 + $0x70] sm:$0xf]  ;;  %v374_v1 = vld [vmem:[%s553_s1 + $0x74] sm:$0xf0]  ;;  %v373_v2 = vld [vmem:[%s553_s1 + $0x74] sm:$0xf] }
   0x2   :  { %v352_v3 = vor.u32 %v374_v1, %v351_v0  ;;  %v353_v4 = vld [vmem:[%s553_s1 + $0x78] sm:$0xf0]  ;;  %v343_v5 = vld [vmem:[%s553_s1 + $0x60] sm:$0xf]  ;;  %v372_v6 = vld [vmem:[%s553_s1 + $0x64] sm:$0xf0] }
   0x3   :  { %v356_v7 = vor.u32 %v373_v2, %v353_v4  ;;  %v371_v8 = vld [vmem:[%s553_s1 + $0x64] sm:$0xf]  ;;  %v345_v9 = vld [vmem:[%s553_s1 + $0x68] sm:$0xf0]  ;;  %v344_v10 = vor.u32 %v372_v6, %v343_v5  ;;  %v335_v12 = vld [vmem:[%s553_s1 + $0x50] sm:$0xf] }
   0x4   :  { %152 = vmatpush.bf16.msra.mxu0 %v352_v3  ;;  %375 = vmatpush.bf16.msra.mxu2 %v352_v3  ;;  %v348_v11 = vor.u32 %v371_v8, %v345_v9  ;;  %v370_v13 = vld [vmem:[%s553_s1 + $0x54] sm:$0xf0]  ;;  %v369_v14 = vld [vmem:[%s553_s1 + $0x54] sm:$0xf]  ;;  %v337_v15 = vld [vmem:[%s553_s1 + $0x58] sm:$0xf0] }
   0x5   :  { %171 = vmatpush.bf16.msra.mxu1 %v356_v7  ;;  %383 = vmatpush.bf16.msra.mxu3 %v356_v7  ;;  %v336_v16 = vor.u32 %v370_v13, %v335_v12  ;;  %v340_v17 = vor.u32 %v369_v14, %v337_v15  ;;  %v327_v18 = vld [vmem:[%s553_s1 + $0x40] sm:$0xf]  ;;  %v368_v19 = vld [vmem:[%s553_s1 + $0x44] sm:$0xf0]  ;;  %v367_v20 = vld [vmem:[%s553_s1 + $0x44] sm:$0xf] }
   0x6   :  { %v329_v21 = vld [vmem:[%s553_s1 + $0x48] sm:$0xf0]  ;;  %v328_v22 = vor.u32 %v368_v19, %v327_v18  ;;  %v319_v24 = vld [vmem:[%s553_s1 + $0x30] sm:$0xf]  ;;  %v366_v25 = vld [vmem:[%s553_s1 + $0x34] sm:$0xf0] }
   0x7   :  { %v332_v23 = vor.u32 %v367_v20, %v329_v21  ;;  %v365_v26 = vld [vmem:[%s553_s1 + $0x34] sm:$0xf]  ;;  %v321_v27 = vld [vmem:[%s553_s1 + $0x38] sm:$0xf0]  ;;  %v320_v28 = vor.u32 %v366_v25, %v319_v24  ;;  %v311_v30 = vld [vmem:[%s553_s1 + $0x20] sm:$0xf] }
   0x8   :  { %153 = vmatpush.bf16.msra.mxu0 %v344_v10  ;;  %376 = vmatpush.bf16.msra.mxu2 %v344_v10  ;;  %v324_v29 = vor.u32 %v365_v26, %v321_v27  ;;  %v364_v31 = vld [vmem:[%s553_s1 + $0x24] sm:$0xf0]  ;;  %v363_v32 = vld [vmem:[%s553_s1 + $0x24] sm:$0xf]  ;;  %v313_v33 = vld [vmem:[%s553_s1 + $0x28] sm:$0xf0] }
   0x9   :  { %172 = vmatpush.bf16.msra.mxu1 %v348_v11  ;;  %384 = vmatpush.bf16.msra.mxu3 %v348_v11  ;;  %v312_v34 = vor.u32 %v364_v31, %v311_v30  ;;  %v316_v35 = vor.u32 %v363_v32, %v313_v33  ;;  %v303_v36 = vld [vmem:[%s553_s1 + $0x10] sm:$0xf]  ;;  %v362_v37 = vld [vmem:[%s553_s1 + $0x14] sm:$0xf0]  ;;  %v361_v38 = vld [vmem:[%s553_s1 + $0x14] sm:$0xf] }
   0xa   :  { %v305_v39 = vld [vmem:[%s553_s1 + $0x18] sm:$0xf0]  ;;  %v304_v40 = vor.u32 %v362_v37, %v303_v36  ;;  %v295_v42 = vld [vmem:[%s553_s1] sm:$0xf]  ;;  %v360_v43 = vld [vmem:[%s553_s1 + $0x4] sm:$0xf0] }
   0xb   :  { %v308_v41 = vor.u32 %v361_v38, %v305_v39  ;;  %v359_v44 = vld [vmem:[%s553_s1 + $0x4] sm:$0xf]  ;;  %v297_v45 = vld [vmem:[%s553_s1 + $0x8] sm:$0xf0]  ;;  %v296_v46 = vor.u32 %v360_v43, %v295_v42  ;;  %v217_v50 = vld [vmem:[%s555_s2] sm:$0x3] }
   0xc   :  { %154 = vmatpush.bf16.msra.mxu0 %v336_v16  ;;  %377 = vmatpush.bf16.msra.mxu2 %v336_v16  ;;  %v300_v47 = vor.u32 %v359_v44, %v297_v45  ;;  %v357_v48 = vld [vmem:[%s554_s0] sm:$0xff]  ;;  %v358_v49 = vld [vmem:[%s554_s0 + $0x8] sm:$0xff]  ;;  %v219_v52 = vperm.slane %v217_v50, 0  ;;  %v220_v54 = vperm.slane %v217_v50, 1  ;;  %v247_v1 = vld [vmem:[%s557_s4 + $0x10] sm:$0xff] }
   0xd   :  { %173 = vmatpush.bf16.msra.mxu1 %v340_v17  ;;  %385 = vmatpush.bf16.msra.mxu3 %v340_v17  ;;  %v231_v51 = vld [vmem:[%s556_s3] sm:$0x3]  ;;  %v246_v5 = vld [vmem:[%s557_s4 + $0x8] sm:$0xff]  ;;  %v253_v8 = vunpack.c.l.bf16 %v247_v1  ;;  %v254_v12 = vunpack.c.h.bf16 %v247_v1  ;;  %v248_v26 = vld [vmem:[%s557_s4 + $0x18] sm:$0xff] }
   0xe   :  { %v245_v53 = vld [vmem:[%s557_s4] sm:$0xff]  ;;  %v233_v55 = vperm.slane %v231_v51, 0  ;;  %v234_v57 = vperm.slane %v231_v51, 1  ;;  %v251_v16 = vunpack.c.l.bf16 %v246_v5  ;;  %v252_v21 = vunpack.c.h.bf16 %v246_v5 }
   0xf   :  { %v249_v59 = vunpack.c.l.bf16 %v245_v53  ;;  %v250_v62 = vunpack.c.h.bf16 %v245_v53  ;;  %v256_v39 = vunpack.c.h.bf16 %v248_v26 }
  0x10   :  { %155 = vmatpush.bf16.msra.mxu0 %v328_v22  ;;  %378 = vmatpush.bf16.msra.mxu2 %v328_v22 }
  0x11   :  { %174 = vmatpush.bf16.msra.mxu1 %v332_v23  ;;  %386 = vmatpush.bf16.msra.mxu3 %v332_v23 }
  0x14   :  { %156 = vmatpush.bf16.msra.mxu0 %v320_v28  ;;  %379 = vmatpush.bf16.msra.mxu2 %v320_v28 }
  0x15   :  { %175 = vmatpush.bf16.msra.mxu1 %v324_v29  ;;  %387 = vmatpush.bf16.msra.mxu3 %v324_v29 }
  0x18   :  { %157 = vmatpush.bf16.msra.mxu0 %v312_v34  ;;  %380 = vmatpush.bf16.msra.mxu2 %v312_v34  ;;  %v255_v34 = vunpack.c.l.bf16 %v248_v26 }
  0x19   :  { %176 = vmatpush.bf16.msra.mxu1 %v316_v35  ;;  %388 = vmatpush.bf16.msra.mxu3 %v316_v35 }
  0x1c   :  { %158 = vmatpush.bf16.msra.mxu0 %v304_v40  ;;  %381 = vmatpush.bf16.msra.mxu2 %v304_v40 }
  0x1d   :  { %177 = vmatpush.bf16.msra.mxu1 %v308_v41  ;;  %389 = vmatpush.bf16.msra.mxu3 %v308_v41 }
  0x20   :  { %159 = vmatpush.bf16.msra.mxu0 %v296_v46  ;;  %382 = vmatpush.bf16.msra.mxu2 %v296_v46 }
  0x21   :  { %178 = vmatpush.bf16.msra.mxu1 %v300_v47  ;;  %390 = vmatpush.bf16.msra.mxu3 %v300_v47 }
  0x23   :  { %160 = vmatmul.bf16.vlgmr.msra.gmra.mxu0 %v357_v48  ;;  %165 = vmatmul.bf16.vlgmr.msra.gmra.mxu2 %v358_v49 }
  0x24   :  { %179 = vmatmul.bf16.vlgmr.msra.gmra.mxu1 %v357_v48  ;;  %184 = vmatmul.bf16.vlgmr.msra.gmra.mxu3 %v358_v49 }
  0xa0   :  { %v161_v56 = vpop.f32.mrf.mxu0 }
  0xa1   :  { %v223_v58 = vmul.f32 %v219_v52, %v161_v56  ;;  %v180_v60 = vpop.f32.mrf.mxu1 }
  0xa2   :  { %v224_v61 = vmul.f32 %v220_v54, %v180_v60 }
  0xa3   :  { %v237_v63 = vadd.f32 %v233_v55, %v223_v58 }
  0xa4   :  { %v238_v0 = vadd.f32 %v234_v57, %v224_v61 }
  0xa5   :  { %v257_v2 = vadd.f32 %v249_v59, %v237_v63 }
  0xa6   :  { %v258_v3 = vadd.f32 %v250_v62, %v238_v0  ;;  %v166_v4 = vpop.f32.mrf.mxu2 }
  0xa7   :  { %v265_v6 = vmax.f32 %v257_v2, 0.0  ;;  %v227_v7 = vmul.f32 %v219_v52, %v166_v4  ;;  %v185_v9 = vpop.f32.mrf.mxu3 }
  0xa8   :  { %v266_v10 = vmax.f32 %v258_v3, 0.0  ;;  %v228_v11 = vmul.f32 %v220_v54, %v185_v9  ;;  %v163_v13 = vpop.f32.mrf.mxu0 }
  0xa9   :  { %v241_v14 = vadd.f32 %v233_v55, %v227_v7  ;;  %v225_v15 = vmul.f32 %v219_v52, %v163_v13  ;;  %v182_v17 = vpop.f32.mrf.mxu1 }
  0xaa   :  { %v273_v18 = vpack.c.bf16 %v266_v10, %v265_v6  ;;  %v242_v19 = vadd.f32 %v234_v57, %v228_v11  ;;  %v226_v20 = vmul.f32 %v220_v54, %v182_v17 }
  0xab   :  { %v261_v22 = vadd.f32 %v253_v8, %v241_v14  ;;  %v239_v23 = vadd.f32 %v233_v55, %v225_v15 }
  0xac   :  { %277 = vst [vmem:[%s558_s5] sm:$0xff] %v273_v18  ;;  %v262_v24 = vadd.f32 %v254_v12, %v242_v19  ;;  %v240_v25 = vadd.f32 %v234_v57, %v226_v20 }
  0xad   :  { %v269_v27 = vmax.f32 %v261_v22, 0.0  ;;  %v259_v28 = vadd.f32 %v251_v16, %v239_v23 }
  0xae   :  { %v270_v29 = vmax.f32 %v262_v24, 0.0  ;;  %v260_v30 = vadd.f32 %v252_v21, %v240_v25  ;;  %v168_v31 = vpop.f32.mrf.mxu2 }
  0xaf   :  { %v267_v32 = vmax.f32 %v259_v28, 0.0  ;;  %v229_v33 = vmul.f32 %v219_v52, %v168_v31  ;;  %v187_v35 = vpop.f32.mrf.mxu3 }
  0xb0   :  { %v275_v36 = vpack.c.bf16 %v270_v29, %v269_v27  ;;  %v268_v37 = vmax.f32 %v260_v30, 0.0  ;;  %v230_v38 = vmul.f32 %v220_v54, %v187_v35 }
  0xb1   :  { %v243_v40 = vadd.f32 %v233_v55, %v229_v33 }
  0xb2   :  { %279 = vst [vmem:[%s558_s5 + $0x10] sm:$0xff] %v275_v36  ;;  %v274_v41 = vpack.c.bf16 %v268_v37, %v267_v32  ;;  %v244_v42 = vadd.f32 %v234_v57, %v230_v38 }
  0xb3   :  { %v263_v43 = vadd.f32 %v255_v34, %v243_v40 }
  0xb4   :  { %278 = vst [vmem:[%s558_s5 + $0x8] sm:$0xff] %v274_v41  ;;  %v264_v44 = vadd.f32 %v256_v39, %v244_v42 }
  0xb5   :  { %v271_v45 = vmax.f32 %v263_v43, 0.0 }
  0xb6   :  { %v272_v46 = vmax.f32 %v264_v44, 0.0 }
  0xb8   :  { %v276_v47 = vpack.c.bf16 %v272_v46, %v271_v45 }
  0xba   :  { %280 = vst [vmem:[%s558_s5 + $0x18] sm:$0xff] %v276_v47 }

// kernel: _lambda_.15
= control target key start
LH: loop header
LB: loop body
LE: loop exit
PB: predicated region body
PF: predicated region fallthrough
CT: control target
= control target key end

     0   :  { %s1978_s21 = smov 0   ;;  %s1980_s22 = smov 0   ;;  %s2284_s0 = inlined_call_operand.vmem [shape: bf16[2,6,6,128], index: 0, kind: input, shape index: {}, may-alias: {0,1,2}]   ;;  %s2285_s1 = inlined_call_operand.vmem [shape: bf16[2,6,6,128], index: 1, kind: input, shape index: {}, may-alias: {0,1,2}]   ;;  %s2286_s2 = inlined_call_operand.vmem [shape: bf16[2,6,6,128], index: 2, kind: input, shape index: {}, may-alias: {0,1,2}]   ;;  %s2287_s3 = inlined_call_operand.vmem [shape: bf16[3,3,128,128], index: 3, kind: input, shape index: {}]   ;;  %s2288_s4 = inlined_call_operand.vmem [shape: f32[1,128], index: 4, kind: input, shape index: {}]   ;;  %s2289_s5 = inlined_call_operand.vmem [shape: f32[1,128], index: 5, kind: input, shape index: {}]   ;;  %s2290_s6 = inlined_call_operand.vmem [shape: bf16[2,4,4,128], index: 6, kind: output, shape index: {}]  }
   0x1   :  { %s1982_s23 = smov 0   ;;  %s1984_s24 = smov 0  }
   0x2   :  { %s1986_s25 = smov 0  }
   0x3 LB: > { %s28_s26 = sadd.s32 1, %s1933_s23  ;;  %s35_s27 = sadd.s32 1, %s1937_s24  ;;  %s1941_s25 = sphi %s1986_s25, %s16_s25   ;;  %s1937_s24 = sphi %s1984_s24, %s2295_s24   ;;  %s1933_s23 = sphi %s1982_s23, %s2294_s23   ;;  %s1929_s22 = sphi %s1980_s22, %s2293_s22   ;;  %s1925_s21 = sphi %s1978_s21, %s2292_s21  }
   0x4   : > { %p29_p0 = scmp.ge.s32.totalorder %s28_s26, 4  ;;  %p1364_p1 = scmp.ge.s32.totalorder %s1941_s25, 1 }
   0x5   : > { %p303_p2 = scmp.lt.s32.totalorder %s1941_s25, 9 }
   0x6   : > { %s2297_s26 = smov (%p29_p0, %s28_s26), 0  ;;  %s2299_s27 = smov (!%p29_p0, %s35_s27), %s1937_s24 }
   0x7   : > { %p304_p3 = pnand %p1364_p1, %p303_p2  ;;  %p37_p4 = scmp.ge.s32.totalorder %s2299_s27, 2 }
   0x8   : > { %p370_p5 = scmp.lt.s32.totalorder (!%p304_p3), %s1929_s22, 1  ;;  %p372_p6 = scmp.lt.s32.totalorder (!%p304_p3), %s1925_s21, 5 }
   0x9   : > { %s2301_s27 = smov (%p37_p4, %s2299_s27), 0  ;;  %307 = sbr.rel (%p304_p3) target bundleno = 247 (0xf7), region = 44 }
   0xa   : > { %s378_s10 = sadd.s32 (!%p304_p3), 1, %s1925_s21  ;;  %s388_s12 = sadd.s32 (!%p304_p3), 2, %s1925_s21 }
   0xb   : > { %p381_p7 = scmp.lt.s32.totalorder (!%p304_p3), %s378_s10, 5  ;;  %p2111_p8 = scmp.lt.s32.totalorder (!%p304_p3), %s388_s12, 5 }
   0xc   : > { %p410_p9 = scmp.lt.s32.totalorder (!%p304_p3), %s1925_s21, 3 }
   0xe   : > { %v1803_v0 = vld [vmem:[%s2287_s3 + $0x78] sm:$0xff]  ;;  %v1802_v4 = vld [vmem:[%s2287_s3 + $0x70] sm:$0xff]  ;;  %s2303_s22 = smov (!%p370_p5, %s1929_s22), 1  ;;  %v1801_v8 = vld [vmem:[%s2287_s3 + $0x68] sm:$0xff]  ;;  %s2305_s10 = smov (!%p381_p7, %s378_s10), 5 }
   0xf   : > { %v1811_v1 = vld [vmem:[%s2287_s3 + $0xb8] sm:$0xff]  ;;  %512 = vmatpush.bf16.msra.mxu0 %v1803_v0  ;;  %v1810_v5 = vld [vmem:[%s2287_s3 + $0xb0] sm:$0xff]  ;;  %s373_s20 = scalar_select %p372_p6, %s1925_s21, 5  ;;  %v1809_v9 = vld [vmem:[%s2287_s3 + $0xa8] sm:$0xff] }
  0x10   : > { %v1819_v2 = vld [vmem:[%s2287_s3 + $0xf8] sm:$0xff]  ;;  %653 = vmatpush.bf16.msra.mxu2 %v1811_v1  ;;  %v1818_v6 = vld [vmem:[%s2287_s3 + $0xf0] sm:$0xff]  ;;  %s2039_s28 = smul.u32 6, %s2303_s22  ;;  %v1817_v10 = vld [vmem:[%s2287_s3 + $0xe8] sm:$0xff]  ;;  %s2307_s12 = smov (!%p2111_p8, %s388_s12), 5 }
  0x11   : > { %v1795_v3 = vld [vmem:[%s2287_s3 + $0x38] sm:$0xff]  ;;  %733 = vmatpush.bf16.msra.mxu3 %v1819_v2  ;;  %v1794_v7 = vld [vmem:[%s2287_s3 + $0x30] sm:$0xff]  ;;  %v1793_v11 = vld [vmem:[%s2287_s3 + $0x28] sm:$0xff]  ;;  %s2309_s21 = smov (!%p410_p9, %s1925_s21), 3  ;;  %s1368_s8 = sshll.u32 %s2303_s22, 2 }
  0x12   : > { %573 = vmatpush.bf16.msra.mxu1 %v1795_v3  ;;  %s375_s9 = sadd.s32 %s2039_s28, %s373_s20  ;;  %v1800_v12 = vld [vmem:[%s2287_s3 + $0x60] sm:$0xff]  ;;  %v1799_v16 = vld [vmem:[%s2287_s3 + $0x58] sm:$0xff]  ;;  %v1798_v22 = vld [vmem:[%s2287_s3 + $0x50] sm:$0xff]  ;;  %s384_s29 = sadd.s32 %s2039_s28, %s2305_s10 }
  0x13   : > { %513 = vmatpush.bf16.msra.mxu0 %v1802_v4  ;;  %s1365_s14 = sshll.u32 %s375_s9, 2  ;;  %v1808_v13 = vld [vmem:[%s2287_s3 + $0xa0] sm:$0xff]  ;;  %v1807_v17 = vld [vmem:[%s2287_s3 + $0x98] sm:$0xff]  ;;  %v1806_v23 = vld [vmem:[%s2287_s3 + $0x90] sm:$0xff]  ;;  %s1366_s17 = sshll.u32 %s384_s29, 2 }
  0x14   : > { %654 = vmatpush.bf16.msra.mxu2 %v1810_v5  ;;  %v1816_v14 = vld [vmem:[%s2287_s3 + $0xe0] sm:$0xff]  ;;  %s377_s9 = scalar_lea.vmem %s2284_s0, %s1365_s14  ;;  %v1815_v18 = vld [vmem:[%s2287_s3 + $0xd8] sm:$0xff]  ;;  %v1814_v25 = vld [vmem:[%s2287_s3 + $0xd0] sm:$0xff]  ;;  %s386_s13 = scalar_lea.vmem %s2285_s1, %s1366_s17 }
  0x15   : > { %734 = vmatpush.bf16.msra.mxu3 %v1818_v6  ;;  %v1792_v15 = vld [vmem:[%s2287_s3 + $0x20] sm:$0xff]  ;;  %v1791_v19 = vld [vmem:[%s2287_s3 + $0x18] sm:$0xff]  ;;  %v1790_v26 = vld [vmem:[%s2287_s3 + $0x10] sm:$0xff]  ;;  %s394_s14 = sadd.s32 %s2039_s28, %s2307_s12  ;;  %s416_s29 = sadd.s32 %s1368_s8, %s2309_s21 }
  0x16   : > { %574 = vmatpush.bf16.msra.mxu1 %v1794_v7  ;;  %v2082_v20 = vld [vmem:[%s377_s9] sm:$0x7]  ;;  %v1797_v27 = vld [vmem:[%s2287_s3 + $0x48] sm:$0xff]  ;;  %v1827_v36 = vld [vmem:[%s2287_s3 + $0x138] sm:$0xff]  ;;  %s1367_s11 = sshll.u32 %s394_s14, 2  ;;  %s1369_s10 = sshll.u32 %s416_s29, 1 }
  0x17   : > { %514 = vmatpush.bf16.msra.mxu0 %v1801_v8  ;;  %v454_v21 = vunpack.c.l.b16 %v2082_v20  ;;  %v1805_v28 = vld [vmem:[%s2287_s3 + $0x88] sm:$0xff]  ;;  %v1796_v32 = vld [vmem:[%s2287_s3 + $0x40] sm:$0xff]  ;;  %v1843_v37 = vld [vmem:[%s2287_s3 + $0x1b8] sm:$0xff]  ;;  %s396_s18 = scalar_lea.vmem %s2286_s2, %s1367_s11  ;;  %s418_s15 = scalar_lea.vmem %s2290_s6, %s1369_s10 }
  0x18   : > { %655 = vmatpush.bf16.msra.mxu2 %v1809_v9  ;;  %v1813_v30 = vld [vmem:[%s2287_s3 + $0xc8] sm:$0xff]  ;;  %v1804_v33 = vld [vmem:[%s2287_s3 + $0x80] sm:$0xff]  ;;  %v1851_v40 = vld [vmem:[%s2287_s3 + $0x1f8] sm:$0xff] }
  0x19   : > { %735 = vmatpush.bf16.msra.mxu3 %v1817_v10  ;;  %v455_v24 = vpack.c.b16 %v454_v21, %v454_v21  ;;  %v1789_v31 = vld [vmem:[%s2287_s3 + $0x8] sm:$0xff]  ;;  %v1812_v38 = vld [vmem:[%s2287_s3 + $0xc0] sm:$0xff]  ;;  %v1835_v41 = vld [vmem:[%s2287_s3 + $0x178] sm:$0xff] }
  0x1a   : > { %575 = vmatpush.bf16.msra.mxu1 %v1793_v11  ;;  %v1788_v39 = vld [vmem:[%s2287_s3] sm:$0xff]  ;;  %v1826_v44 = vld [vmem:[%s2287_s3 + $0x130] sm:$0xff]  ;;  %v1825_v49 = vld [vmem:[%s2287_s3 + $0x128] sm:$0xff] }
  0x1b   : > { %515 = vmatpush.bf16.msra.mxu0 %v1800_v12  ;;  %v459_v29 = vshll.u32 %v455_v24, 16  ;;  %v457_v34 = vshrl.u32 %v455_v24, 16  ;;  %v603_v42 = vrot.slane %v455_v24, 1  ;;  %v1842_v45 = vld [vmem:[%s2287_s3 + $0x1b0] sm:$0xff]  ;;  %v667_v48 = vld [vmem:[%s386_s13] sm:$0x7] }
  0x1c   : > { %656 = vmatpush.bf16.msra.mxu2 %v1808_v13  ;;  %v1850_v46 = vld [vmem:[%s2287_s3 + $0x1f0] sm:$0xff]  ;;  %v1841_v50 = vld [vmem:[%s2287_s3 + $0x1a8] sm:$0xff]  ;;  %v1824_v53 = vld [vmem:[%s2287_s3 + $0x120] sm:$0xff]  ;;  %v765_v58 = vunpack.c.l.b16 %v667_v48 }
  0x1d   : > { %736 = vmatpush.bf16.msra.mxu3 %v1816_v14  ;;  %v461_v35 = vrot.slane %v459_v29, 1  ;;  %v1834_v47 = vld [vmem:[%s2287_s3 + $0x170] sm:$0xff]  ;;  %v1849_v51 = vld [vmem:[%s2287_s3 + $0x1e8] sm:$0xff]  ;;  %v1840_v54 = vld [vmem:[%s2287_s3 + $0x1a0] sm:$0xff] }
  0x1e   : > { %576 = vmatpush.bf16.msra.mxu1 %v1792_v15  ;;  %v1833_v52 = vld [vmem:[%s2287_s3 + $0x168] sm:$0xff]  ;;  %v1848_v55 = vld [vmem:[%s2287_s3 + $0x1e0] sm:$0xff]  ;;  %v1823_v59 = vld [vmem:[%s2287_s3 + $0x118] sm:$0xff]  ;;  %v766_v0 = vpack.c.b16 %v765_v58, %v765_v58 }
  0x1f   : > { %516 = vmatpush.bf16.msra.mxu0 %v1799_v16  ;;  %v462_v43 = vor.u32 %v461_v35, %v457_v34  ;;  %v1832_v56 = vld [vmem:[%s2287_s3 + $0x160] sm:$0xff]  ;;  %v1839_v60 = vld [vmem:[%s2287_s3 + $0x198] sm:$0xff]  ;;  %v1822_v1 = vld [vmem:[%s2287_s3 + $0x110] sm:$0xff] }
  0x20   : > { %657 = vmatpush.bf16.msra.mxu2 %v1807_v17  ;;  %v918_v57 = vld [vmem:[%s396_s18] sm:$0x7]  ;;  %v1847_v62 = vld [vmem:[%s2287_s3 + $0x1d8] sm:$0xff]  ;;  %v1838_v2 = vld [vmem:[%s2287_s3 + $0x190] sm:$0xff]  ;;  %v770_v6 = vshll.u32 %v766_v0, 16  ;;  %v768_v12 = vshrl.u32 %v766_v0, 16 }
  0x21   : > { %737 = vmatpush.bf16.msra.mxu3 %v1815_v18  ;;  %v1016_v61 = vunpack.c.l.b16 %v918_v57  ;;  %v1831_v63 = vld [vmem:[%s2287_s3 + $0x158] sm:$0xff]  ;;  %v1846_v4 = vld [vmem:[%s2287_s3 + $0x1d0] sm:$0xff]  ;;  %v1821_v7 = vld [vmem:[%s2287_s3 + $0x108] sm:$0xff]  ;;  %v854_v24 = vrot.slane %v766_v0, 1 }
  0x22   : > { %577 = vmatpush.bf16.msra.mxu1 %v1791_v19  ;;  %v1830_v5 = vld [vmem:[%s2287_s3 + $0x150] sm:$0xff]  ;;  %v1837_v8 = vld [vmem:[%s2287_s3 + $0x188] sm:$0xff]  ;;  %v772_v13 = vrot.slane %v770_v6, 1  ;;  %v1820_v14 = vld [vmem:[%s2287_s3 + $0x100] sm:$0xff] }
  0x23   : > { %517 = vmatpush.bf16.msra.mxu0 %v1798_v22  ;;  %v1017_v3 = vpack.c.b16 %v1016_v61, %v1016_v61  ;;  %v1845_v10 = vld [vmem:[%s2287_s3 + $0x1c8] sm:$0xff]  ;;  %v1836_v15 = vld [vmem:[%s2287_s3 + $0x180] sm:$0xff]  ;;  %v1859_v16 = vld [vmem:[%s2287_s3 + $0x238] sm:$0xff] }
  0x24   : > { %658 = vmatpush.bf16.msra.mxu2 %v1806_v23  ;;  %v1829_v11 = vld [vmem:[%s2287_s3 + $0x148] sm:$0xff]  ;;  %v1844_v19 = vld [vmem:[%s2287_s3 + $0x1c0] sm:$0xff]  ;;  %v773_v21 = vor.u32 %v772_v13, %v768_v12  ;;  %v1858_v22 = vld [vmem:[%s2287_s3 + $0x230] sm:$0xff] }
  0x25   : > { %738 = vmatpush.bf16.msra.mxu3 %v1814_v25  ;;  %v1021_v9 = vshll.u32 %v1017_v3, 16  ;;  %v1019_v17 = vshrl.u32 %v1017_v3, 16  ;;  %v1857_v25 = vld [vmem:[%s2287_s3 + $0x228] sm:$0xff]  ;;  %v1902_v58 = vld [vmem:[%s2289_s5] ss:$0 sm:$0xff] }
  0x26   : > { %578 = vmatpush.bf16.msra.mxu1 %v1790_v26  ;;  %v1856_v26 = vld [vmem:[%s2287_s3 + $0x220] sm:$0xff]  ;;  %v1853_v29 = vld [vmem:[%s2287_s3 + $0x208] sm:$0xff] }
  0x27   : > { %518 = vmatpush.bf16.msra.mxu0 %v1797_v27  ;;  %v1023_v18 = vrot.slane %v1021_v9, 1  ;;  %v1855_v27 = vld [vmem:[%s2287_s3 + $0x218] sm:$0xff] }
  0x28   : > { %659 = vmatpush.bf16.msra.mxu2 %v1805_v28  ;;  %v1854_v28 = vld [vmem:[%s2287_s3 + $0x210] sm:$0xff] }
  0x29   : > { %739 = vmatpush.bf16.msra.mxu3 %v1813_v30  ;;  %v1024_v23 = vor.u32 %v1023_v18, %v1019_v17  ;;  %v1852_v30 = vld [vmem:[%s2287_s3 + $0x200] sm:$0xff] }
  0x2a   : > { %579 = vmatpush.bf16.msra.mxu1 %v1789_v31  ;;  %v1105_v31 = vrot.slane %v1017_v3, 1 }
  0x2b   : > { %519 = vmatpush.bf16.msra.mxu0 %v1796_v32 }
  0x2c   : > { %660 = vmatpush.bf16.msra.mxu2 %v1804_v33 }
  0x2d   : > { %740 = vmatpush.bf16.msra.mxu3 %v1812_v38 }
  0x2e   : > { %580 = vmatpush.bf16.msra.mxu1 %v1788_v39  ;;  %520 = vmatmul.bf16.vlgmr.msra.gmra.mxu0 %v462_v43 }
  0x2f   : > { %823 = vmatpush.bf16.msrb.mxu0 %v1827_v36  ;;  %661 = vmatmul.bf16.vlgmr.msra.gmra.mxu2 %v603_v42 }
  0x30   : > { %984 = vmatpush.bf16.msrb.mxu2 %v1843_v37  ;;  %741 = vmatmul.bf16.vlgmr.msra.gmra.mxu3 %v667_v48 }
  0x31   : > { %1074 = vmatpush.bf16.msrb.mxu3 %v1851_v40  ;;  %581 = vmatmul.bf16.vlgmr.msra.gmra.mxu1 %v2082_v20  ;;  %v1828_v20 = vld [vmem:[%s2287_s3 + $0x140] sm:$0xff] }
  0x32   : > { %904 = vmatpush.bf16.msrb.mxu1 %v1835_v41 }
  0x33   : > { %824 = vmatpush.bf16.msrb.mxu0 %v1826_v44 }
  0x34   : > { %985 = vmatpush.bf16.msrb.mxu2 %v1842_v45 }
  0x35   : > { %1075 = vmatpush.bf16.msrb.mxu3 %v1850_v46 }
  0x36   : > { %905 = vmatpush.bf16.msrb.mxu1 %v1834_v47 }
  0x37   : > { %825 = vmatpush.bf16.msrb.mxu0 %v1825_v49 }
  0x38   : > { %986 = vmatpush.bf16.msrb.mxu2 %v1841_v50 }
  0x39   : > { %1076 = vmatpush.bf16.msrb.mxu3 %v1849_v51 }
  0x3a   : > { %906 = vmatpush.bf16.msrb.mxu1 %v1833_v52 }
  0x3b   : > { %826 = vmatpush.bf16.msrb.mxu0 %v1824_v53 }
  0x3c   : > { %987 = vmatpush.bf16.msrb.mxu2 %v1840_v54 }
  0x3d   : > { %1077 = vmatpush.bf16.msrb.mxu3 %v1848_v55  ;;  %v1901_v55 = vld [vmem:[%s2288_s4] ss:$0 sm:$0xff] }
  0x3e   : > { %907 = vmatpush.bf16.msrb.mxu1 %v1832_v56 }
  0x3f   : > { %827 = vmatpush.bf16.msrb.mxu0 %v1823_v59 }
  0x40   : > { %988 = vmatpush.bf16.msrb.mxu2 %v1839_v60 }
  0x41   : > { %1078 = vmatpush.bf16.msrb.mxu3 %v1847_v62 }
  0x42   : > { %908 = vmatpush.bf16.msrb.mxu1 %v1831_v63 }
  0x43   : > { %828 = vmatpush.bf16.msrb.mxu0 %v1822_v1 }
  0x44   : > { %989 = vmatpush.bf16.msrb.mxu2 %v1838_v2 }
  0x45   : > { %1079 = vmatpush.bf16.msrb.mxu3 %v1846_v4 }
  0x46   : > { %909 = vmatpush.bf16.msrb.mxu1 %v1830_v5 }
  0x47   : > { %829 = vmatpush.bf16.msrb.mxu0 %v1821_v7 }
  0x48   : > { %990 = vmatpush.bf16.msrb.mxu2 %v1837_v8 }
  0x49   : > { %1080 = vmatpush.bf16.msrb.mxu3 %v1845_v10 }
  0x4a   : > { %910 = vmatpush.bf16.msrb.mxu1 %v1829_v11 }
  0x4b   : > { %830 = vmatpush.bf16.msrb.mxu0 %v1820_v14 }
  0x4c   : > { %991 = vmatpush.bf16.msrb.mxu2 %v1836_v15 }
  0x4d   : > { %1081 = vmatpush.bf16.msrb.mxu3 %v1844_v19 }
  0x4e   : > { %911 = vmatpush.bf16.msrb.mxu1 %v1828_v20  ;;  %831 = vmatmul.bf16.vlgmr.msrb.gmra.mxu0 %v773_v21 }
  0x4f   : > { %1155 = vmatpush.bf16.msra.mxu0 %v1859_v16  ;;  %992 = vmatmul.bf16.vlgmr.msrb.gmra.mxu2 %v918_v57 }
  0x50   : > { %1082 = vmatmul.bf16.vlgmr.msrb.gmra.mxu3 %v1024_v23 }
  0x51   : > { %912 = vmatmul.bf16.vlgmr.msrb.gmra.mxu1 %v854_v24 }
  0x53   : > { %1156 = vmatpush.bf16.msra.mxu0 %v1858_v22 }
  0x57   : > { %1157 = vmatpush.bf16.msra.mxu0 %v1857_v25 }
  0x5b   : > { %1158 = vmatpush.bf16.msra.mxu0 %v1856_v26 }
  0x5f   : > { %1159 = vmatpush.bf16.msra.mxu0 %v1855_v27 }
  0x63   : > { %1160 = vmatpush.bf16.msra.mxu0 %v1854_v28 }
  0x67   : > { %1161 = vmatpush.bf16.msra.mxu0 %v1853_v29 }
  0x6b   : > { %1162 = vmatpush.bf16.msra.mxu0 %v1852_v30 }
  0x6e   : > { %1163 = vmatmul.bf16.vlgmr.msra.gmra.mxu0 %v1105_v31 }
  0xab   : > { %v521_v32 = vpop.f32.mrf.mxu0 }
  0xae   : > { %v582_v33 = vpop.f32.mrf.mxu1 }
  0xaf   : > { %v583_v42 = vadd.f32 %v582_v33, %v521_v32 }
  0xb2   : > { %v662_v34 = vpop.f32.mrf.mxu2 }
  0xb3   : > { %v742_v35 = vpop.f32.mrf.mxu3  ;;  %v523_v36 = vpop.f32.mrf.mxu0  ;;  %v666_v44 = vadd.f32 %v662_v34, %v583_v42 }
  0xb5   : > { %v746_v48 = vadd.f32 %v742_v35, %v666_v44 }
  0xb6   : > { %v584_v37 = vpop.f32.mrf.mxu1 }
  0xba   : > { %v664_v38 = vpop.f32.mrf.mxu2 }
  0xbb   : > { %v744_v39 = vpop.f32.mrf.mxu3 }
  0xcb   : > { %v832_v40 = vpop.f32.mrf.mxu0 }
  0xcc   : > { %v836_v50 = vadd.f32 %v832_v40, %v746_v48 }
  0xce   : > { %v913_v41 = vpop.f32.mrf.mxu1 }
  0xcf   : > { %v917_v52 = vadd.f32 %v913_v41, %v836_v50 }
  0xd2   : > { %v993_v43 = vpop.f32.mrf.mxu2 }
  0xd3   : > { %v1083_v45 = vpop.f32.mrf.mxu3  ;;  %v834_v46 = vpop.f32.mrf.mxu0  ;;  %v997_v53 = vadd.f32 %v993_v43, %v917_v52 }
  0xd5   : > { %v1087_v54 = vadd.f32 %v1083_v45, %v997_v53 }
  0xd6   : > { %v915_v47 = vpop.f32.mrf.mxu1 }
  0xda   : > { %v995_v49 = vpop.f32.mrf.mxu2 }
  0xdb   : > { %v1085_v51 = vpop.f32.mrf.mxu3 }
  0xeb   : > { %v1164_v56 = vpop.f32.mrf.mxu0 }
  0xec   : > { %v1168_v57 = vadd.f32 %v1164_v56, %v1087_v54 }
  0xee   : > { %v1173_v59 = vmul.f32 %v1901_v55, %v1168_v57 }
  0xf0   : > { %v1178_v60 = vadd.f32 %v1902_v58, %v1173_v59 }
  0xf2   : > { %v1179_v61 = vmax.f32 %v1178_v60, 0.0 }
  0xf3   : > { %v1166_v62 = vpop.f32.mrf.mxu0 }
  0xf4   : > { %v1180_v63 = vpack.c.bf16 %v1179_v61, %v1179_v61 }
  0xf6   : > { %1181 = vst [vmem:[%s418_s15] sm:$0x3] %v1180_v63 }
  0xf7 PF: > { %s16_s25 = sadd.s32 1, %s1941_s25   ;;  %s2292_s21 = smov %s1933_s23 }
  0xf8   : > { %p13_p10 = scmp.ge.s32.totalorder %s16_s25, 10   ;;  %s2293_s22 = smov %s1937_s24 }
  0xf9   : > { %s2294_s23 = smov %s2297_s26  ;;  %s2295_s24 = smov %s2301_s27 }
  0xfa   :  { %15 = sbr.rel (!%p13_p10) target bundleno = 3 (0x3), region = 97 }

// kernel: _lambda_.18
= control target key start
LH: loop header
LB: loop body
LE: loop exit
PB: predicated region body
PF: predicated region fallthrough
CT: control target
= control target key end

     0   :  { %s504_s1 = inlined_call_operand.vmem [shape: bf16[256,128], index: 1, kind: input, shape index: {}]   ;;  %s505_s0 = inlined_call_operand.vmem [shape: bf16[32,256], index: 0, kind: input, shape index: {}]   ;;  %s506_s2 = inlined_call_operand.vmem [shape: f32[1,128], index: 2, kind: input, shape index: {}]   ;;  %s507_s3 = inlined_call_operand.vmem [shape: f32[1,128], index: 3, kind: input, shape index: {}]   ;;  %s508_s4 = inlined_call_operand.vmem [shape: bf16[32,128], index: 4, kind: output, shape index: {}]  }
   0x1   :  { %v357_v0 = vld [vmem:[%s504_s1 + $0x38] sm:$0xff]  ;;  %v356_v2 = vld [vmem:[%s504_s1 + $0x30] sm:$0xff]  ;;  %v355_v4 = vld [vmem:[%s504_s1 + $0x28] sm:$0xff] }
   0x2   :  { %v365_v1 = vld [vmem:[%s504_s1 + $0x78] sm:$0xff]  ;;  %181 = vmatpush.bf16.msra.mxu0 %v357_v0  ;;  %377 = vmatpush.bf16.msra.mxu2 %v357_v0  ;;  %v364_v3 = vld [vmem:[%s504_s1 + $0x70] sm:$0xff]  ;;  %v363_v5 = vld [vmem:[%s504_s1 + $0x68] sm:$0xff] }
   0x3   :  { %200 = vmatpush.bf16.msra.mxu1 %v365_v1  ;;  %385 = vmatpush.bf16.msra.mxu3 %v365_v1  ;;  %v354_v6 = vld [vmem:[%s504_s1 + $0x20] sm:$0xff]  ;;  %v353_v8 = vld [vmem:[%s504_s1 + $0x18] sm:$0xff]  ;;  %v352_v10 = vld [vmem:[%s504_s1 + $0x10] sm:$0xff] }
   0x4   :  { %v362_v7 = vld [vmem:[%s504_s1 + $0x60] sm:$0xff]  ;;  %v361_v9 = vld [vmem:[%s504_s1 + $0x58] sm:$0xff]  ;;  %v360_v11 = vld [vmem:[%s504_s1 + $0x50] sm:$0xff] }
   0x5   :  { %v351_v12 = vld [vmem:[%s504_s1 + $0x8] sm:$0xff]  ;;  %v350_v14 = vld [vmem:[%s504_s1] sm:$0xff]  ;;  %v276_v18 = vld [vmem:[%s505_s0 + $0x10] sm:$0xf] }
   0x6   :  { %182 = vmatpush.bf16.msra.mxu0 %v356_v2  ;;  %378 = vmatpush.bf16.msra.mxu2 %v356_v2  ;;  %v359_v13 = vld [vmem:[%s504_s1 + $0x48] sm:$0xff]  ;;  %v358_v15 = vld [vmem:[%s504_s1 + $0x40] sm:$0xff]  ;;  %v349_v19 = vld [vmem:[%s505_s0 + $0x14] sm:$0xf0] }
   0x7   :  { %201 = vmatpush.bf16.msra.mxu1 %v364_v3  ;;  %386 = vmatpush.bf16.msra.mxu3 %v364_v3  ;;  %v268_v16 = vld [vmem:[%s505_s0] sm:$0xf]  ;;  %v347_v17 = vld [vmem:[%s505_s0 + $0x4] sm:$0xf0]  ;;  %v346_v20 = vld [vmem:[%s505_s0 + $0x4] sm:$0xf]  ;;  %v277_v25 = vor.u32 %v349_v19, %v276_v18 }
   0x8   :  { %v270_v21 = vld [vmem:[%s505_s0 + $0x8] sm:$0xf0]  ;;  %v348_v22 = vld [vmem:[%s505_s0 + $0x14] sm:$0xf]  ;;  %v278_v23 = vld [vmem:[%s505_s0 + $0x18] sm:$0xf0]  ;;  %v269_v24 = vor.u32 %v347_v17, %v268_v16 }
   0x9   :  { %v273_v26 = vor.u32 %v346_v20, %v270_v21  ;;  %v281_v27 = vor.u32 %v348_v22, %v278_v23  ;;  %v393_v31 = vld [vmem:[%s506_s2] ss:$0 sm:$0xff] }
   0xa   :  { %183 = vmatpush.bf16.msra.mxu0 %v355_v4  ;;  %379 = vmatpush.bf16.msra.mxu2 %v355_v4  ;;  %v394_v35 = vld [vmem:[%s507_s3] ss:$0 sm:$0xff] }
   0xb   :  { %202 = vmatpush.bf16.msra.mxu1 %v363_v5  ;;  %387 = vmatpush.bf16.msra.mxu3 %v363_v5 }
   0xe   :  { %184 = vmatpush.bf16.msra.mxu0 %v354_v6  ;;  %380 = vmatpush.bf16.msra.mxu2 %v354_v6 }
   0xf   :  { %203 = vmatpush.bf16.msra.mxu1 %v362_v7  ;;  %388 = vmatpush.bf16.msra.mxu3 %v362_v7 }
  0x12   :  { %185 = vmatpush.bf16.msra.mxu0 %v353_v8  ;;  %381 = vmatpush.bf16.msra.mxu2 %v353_v8 }
  0x13   :  { %204 = vmatpush.bf16.msra.mxu1 %v361_v9  ;;  %389 = vmatpush.bf16.msra.mxu3 %v361_v9 }
  0x16   :  { %186 = vmatpush.bf16.msra.mxu0 %v352_v10  ;;  %382 = vmatpush.bf16.msra.mxu2 %v352_v10 }
  0x17   :  { %205 = vmatpush.bf16.msra.mxu1 %v360_v11  ;;  %390 = vmatpush.bf16.msra.mxu3 %v360_v11 }
  0x1a   :  { %187 = vmatpush.bf16.msra.mxu0 %v351_v12  ;;  %383 = vmatpush.bf16.msra.mxu2 %v351_v12 }
  0x1b   :  { %206 = vmatpush.bf16.msra.mxu1 %v359_v13  ;;  %391 = vmatpush.bf16.msra.mxu3 %v359_v13 }
  0x1e   :  { %188 = vmatpush.bf16.msra.mxu0 %v350_v14  ;;  %384 = vmatpush.bf16.msra.mxu2 %v350_v14 }
  0x1f   :  { %207 = vmatpush.bf16.msra.mxu1 %v358_v15  ;;  %392 = vmatpush.bf16.msra.mxu3 %v358_v15 }
  0x21   :  { %189 = vmatmul.bf16.vlgmr.msra.gmra.mxu0 %v269_v24  ;;  %194 = vmatmul.bf16.vlgmr.msra.gmra.mxu2 %v277_v25 }
  0x22   :  { %208 = vmatmul.bf16.vlgmr.msra.gmra.mxu1 %v273_v26  ;;  %213 = vmatmul.bf16.vlgmr.msra.gmra.mxu3 %v281_v27 }
  0x9e   :  { %v190_v28 = vpop.f32.mrf.mxu0 }
  0x9f   :  { %v209_v29 = vpop.f32.mrf.mxu1 }
  0xa0   :  { %v210_v30 = vadd.f32 %v209_v29, %v190_v28 }
  0xa2   :  { %v238_v34 = vmul.f32 %v393_v31, %v210_v30 }
  0xa4   :  { %v195_v32 = vpop.f32.mrf.mxu2  ;;  %v246_v40 = vadd.f32 %v394_v35, %v238_v34 }
  0xa5   :  { %v214_v33 = vpop.f32.mrf.mxu3 }
  0xa6   :  { %v192_v36 = vpop.f32.mrf.mxu0  ;;  %v215_v38 = vadd.f32 %v214_v33, %v195_v32  ;;  %v250_v46 = vmax.f32 %v246_v40, 0.0 }
  0xa7   :  { %v211_v37 = vpop.f32.mrf.mxu1 }
  0xa8   :  { %v212_v39 = vadd.f32 %v211_v37, %v192_v36  ;;  %v240_v42 = vmul.f32 %v393_v31, %v215_v38 }
  0xaa   :  { %v239_v41 = vmul.f32 %v393_v31, %v212_v39  ;;  %v248_v49 = vadd.f32 %v394_v35, %v240_v42 }
  0xac   :  { %v247_v43 = vadd.f32 %v394_v35, %v239_v41  ;;  %v197_v44 = vpop.f32.mrf.mxu2  ;;  %v252_v53 = vmax.f32 %v248_v49, 0.0 }
  0xad   :  { %v216_v45 = vpop.f32.mrf.mxu3 }
  0xae   :  { %v251_v47 = vmax.f32 %v247_v43, 0.0  ;;  %v217_v48 = vadd.f32 %v216_v45, %v197_v44 }
  0xb0   :  { %v369_v50 = vpack.c.bf16 %v251_v47, %v250_v46  ;;  %v241_v51 = vmul.f32 %v393_v31, %v217_v48 }
  0xb2   :  { %370 = vst [vmem:[%s508_s4] sm:$0xff] %v369_v50   ;;  %v249_v52 = vadd.f32 %v394_v35, %v241_v51 }
  0xb4   :  { %v253_v54 = vmax.f32 %v249_v52, 0.0 }
  0xb6   :  { %v374_v55 = vpack.c.bf16 %v253_v54, %v252_v53 }
  0xb8   :  { %376 = vst [vmem:[%s508_s4 + $0x8] sm:$0xff] %v374_v55  }

</bundles_post_ra>
